<compile_context>
chip_gen: v6e
topology: v6e:2x2x1
jax: 0.10.0
libtpu: 0.0.40
codegen_flags: <defaults>
</compile_context>

<pallas_src>
import functools

import jax
import jax.numpy as jnp
from jax import lax
from jax.experimental import pallas as pl
from jax.experimental.pallas import tpu as pltpu

BN_EPS = 1e-5
_EXACT = lax.Precision.HIGHEST   # one-hot gather + once-per-call matmuls
_FAST = None                     # per-edge-tile msg MLP / scatter (default MXU)


def _mpnn_kernel(h0T_ref, idx_ref, invdeg_ref, slab_ref,
                 outT_ref,
                 hT_scr, acc_scr, niota_scr):
    f32 = jnp.float32
    e = pl.program_id(0)

    # slab layout: [slot, out (<=4, zero-padded), cols 0:8 weight | col 8 bias]
    #   slot 0: lin_in                 slot 1: mlp_msg L1 (i | j halves)
    #   slot 2: mlp_msg L2             slot 3: mlp_upd L1 (h | aggr halves)
    #   slot 4: mlp_upd L2             slot 5: lin_pred (rows padded to 4)

    # ---- step 0: h = lin_in(cat(pos, vel)), transposed [4, Np]; zero acc;
    #      precompute node-id column iota once and reuse every tile.
    @pl.when(e == 0)
    def _init():
        s0 = slab_ref[0]
        hT_scr[...] = (jnp.dot(s0[:, 0:4], h0T_ref[...],
                               preferred_element_type=f32,
                               precision=_EXACT) + s0[:, 8:9])
        acc_scr[...] = jnp.zeros_like(acc_scr)
        niota_scr[...] = lax.broadcasted_iota(jnp.int32, niota_scr.shape, 0)

    hT = hT_scr[...]                         # [4, Np]
    idx = idx_ref[0]                         # [1, 2*TE] int32: [dst | src]
    TE = idx.shape[1] // 2

    # ---- stacked one-hot selector oh[n, r] = (idx[r] == n), single pass ----
    oh = jnp.where(niota_scr[...] == idx, f32(1.0), f32(0.0))    # [Np, 2*TE]

    # ---- fused gather: one [4,Np] x [Np,2TE] MXU contraction (exact f32) ---
    g = jnp.dot(hT, oh, preferred_element_type=f32, precision=_EXACT)
    h_iT = g[:, :TE]                         # target (dst) node features
    h_jT = g[:, TE:]                         # source (src) node features

    # ---- message MLP (BN folded; concat removed via weight split) ----------
    s1 = slab_ref[1]
    s2 = slab_ref[2]
    x = (jnp.dot(s1[:, 0:4], h_iT, preferred_element_type=f32, precision=_FAST)
         + jnp.dot(s1[:, 4:8], h_jT, preferred_element_type=f32, precision=_FAST)
         + s1[:, 8:9])
    x = jnp.tanh(x)
    msgT = jnp.tanh(jnp.dot(s2[:, 0:4], x, preferred_element_type=f32,
                            precision=_FAST) + s2[:, 8:9])       # [4, TE]

    # torch semantics: msg[(h_i - h_j == 0).all(dim=1)] = 0  (exact, since the
    # gather is HIGHEST precision; also zeroes the node-0 padding self-loops)
    same = jnp.max(jnp.abs(h_iT - h_jT), axis=0, keepdims=True) == f32(0.0)
    msgT = jnp.where(same, f32(0.0), msgT)

    # ---- merged scatter over this edge tile (add; mean applied at finalize) -
    oh_dst = oh[:, :TE]                                          # [Np, TE]
    acc_scr[...] += lax.dot_general(
        msgT, oh_dst, (((1,), (1,)), ((), ())),
        preferred_element_type=f32, precision=_FAST)             # [4, Np]

    # ---- finalize on the last edge tile: add/mean split + update + pred ----
    @pl.when(e == pl.num_programs(0) - 1)
    def _finalize():
        acc = acc_scr[...]
        half = acc.shape[0] // 2     # torch aggregate: [:, :2]=add, [:, 2:]=mean
        feat = lax.broadcasted_iota(jnp.int32, acc.shape, 0)
        aggrT = acc * jnp.where(feat >= half, invdeg_ref[...], f32(1.0))

        s3 = slab_ref[3]
        s4 = slab_ref[4]
        s5 = slab_ref[5]
        y = jnp.tanh(
            jnp.dot(s3[:, 0:4], hT, preferred_element_type=f32, precision=_EXACT)
            + jnp.dot(s3[:, 4:8], aggrT, preferred_element_type=f32,
                      precision=_EXACT)
            + s3[:, 8:9])
        accT = jnp.tanh(jnp.dot(s4[:, 0:4], y, preferred_element_type=f32,
                                precision=_EXACT) + s4[:, 8:9])  # [4, Np]
        outT_ref[...] = (jnp.dot(s5[:, 0:4], accT, preferred_element_type=f32,
                                 precision=_EXACT) + s5[:, 8:9])  # [4, Np]


def init_params(key, emb_dim=4, layer_out_dim=4, out_dim=2):
    """Torch-style init; weights stored transposed [out, in], biases [out, 1].
    Eval-mode BatchNorm (running_mean=0, running_var=1) is folded into the
    preceding Linear: W' = s*W, b' = s*b + shift."""
    keys = iter(jax.random.split(key, 32))

    def lin_t(in_d, out_d):
        bound = 1.0 / (in_d ** 0.5)
        w = jax.random.uniform(next(keys), (out_d, in_d), jnp.float32, -bound, bound)
        b = jax.random.uniform(next(keys), (out_d, 1), jnp.float32, -bound, bound)
        return w, b

    def bn_fold(d):
        gamma = jax.random.uniform(next(keys), (d, 1), jnp.float32, 0.5, 1.5)
        beta = jax.random.uniform(next(keys), (d, 1), jnp.float32, -0.5, 0.5)
        scale = gamma / jnp.sqrt(1.0 + BN_EPS)     # eval-mode running stats
        return scale, beta

    w_in, b_in = lin_t(4, 4)                                   # lin_in

    w_m1, b_m1 = lin_t(2 * 4, emb_dim)                         # mlp_msg L1 + BN
    s, sh = bn_fold(emb_dim)
    w_m1, b_m1 = w_m1 * s, b_m1 * s + sh
    w_m1_i, w_m1_j = w_m1[:, :4], w_m1[:, 4:]                  # cat([h_i, h_j])

    w_m2, b_m2 = lin_t(emb_dim, layer_out_dim)                 # mlp_msg L2 + BN
    s, sh = bn_fold(layer_out_dim)
    w_m2, b_m2 = w_m2 * s, b_m2 * s + sh

    w_u1, b_u1 = lin_t(layer_out_dim + 4, emb_dim)             # mlp_upd L1 + BN
    s, sh = bn_fold(emb_dim)
    w_u1, b_u1 = w_u1 * s, b_u1 * s + sh
    w_u_h, w_u_a = w_u1[:, :4], w_u1[:, 4:]                    # cat([h, aggr])

    w_u2, b_u2 = lin_t(emb_dim, layer_out_dim)                 # mlp_upd L2 + BN
    s, sh = bn_fold(layer_out_dim)
    w_u2, b_u2 = w_u2 * s, b_u2 * s + sh

    w_p, b_p = lin_t(layer_out_dim, out_dim)                   # lin_pred

    return (w_in, b_in, w_m1_i, w_m1_j, b_m1, w_m2, b_m2,
            w_u_h, w_u_a, b_u1, w_u2, b_u2, w_p, b_p)


def _pack_weight_slab(params):
    """Pack the 14 tiny weight/bias arrays into a single (6, 4, 9) f32 slab:
    rows = output features (zero-padded to 4), cols 0:8 = weight columns
    (zero-padded), col 8 = bias.  One kernel arg instead of 14."""
    (w_in, b_in, w_m1_i, w_m1_j, b_m1, w_m2, b_m2,
     w_u_h, w_u_a, b_u1, w_u2, b_u2, w_p, b_p) = params

    def slot(ws, b):
        s = jnp.zeros((4, 9), jnp.float32)
        col = 0
        for w in ws:
            o, i = w.shape
            assert o <= 4 and col + i <= 8, "kernel packs dims <= (4, 8)"
            s = s.at[:o, col:col + i].set(w.astype(jnp.float32))
            col += i
        s = s.at[:b.shape[0], 8].set(b.reshape(-1).astype(jnp.float32))
        return s

    return jnp.stack([slot([w_in], b_in),
                      slot([w_m1_i, w_m1_j], b_m1),
                      slot([w_m2], b_m2),
                      slot([w_u_h, w_u_a], b_u1),
                      slot([w_u2], b_u2),
                      slot([w_p], b_p)])                       # [6, 4, 9]


@functools.partial(jax.jit, static_argnames=("edge_tile",))
def mpnn_flocking_forward(pos, vel, edge_index, params, edge_tile=256):
    N = pos.shape[0]
    E = edge_index.shape[1]
    out_dim = params[-2].shape[0]                 # lin_pred rows
    # kernel is specialized to the module defaults (4-feature nodes, emb=4,
    # layer_out=4) -- the add/mean split and slab slicing assume it.
    assert params[0].shape == (4, 4) and params[5].shape[0] == 4
    assert params[2].shape[0] <= 4 and out_dim <= 4

    # lane-dense node axis
    Np = max(128, ((N + 127) // 128) * 128)

    h0 = jnp.concatenate([pos, vel], axis=-1).astype(jnp.float32)      # [N, 4]
    h0T = jnp.zeros((4, Np), jnp.float32).at[:, :N].set(h0.T)          # [4, Np]

    src = edge_index[0].astype(jnp.int32)
    dst = edge_index[1].astype(jnp.int32)

    # per-node in-degree over the REAL edges (mean denominator; masked real
    # edges still count, exactly like torch-scatter reduce='mean')
    deg = jnp.zeros((Np,), jnp.float32).at[dst].add(1.0)
    invdegT = (1.0 / jnp.maximum(deg, 1.0)).reshape(1, Np)

    # 128-aligned edge tile, capped so the [Np, 2*TE] one-hot slab stays well
    # inside v7x's 64 MiB physical VMEM (raise the budget on v5e/v6e for
    # larger tiles if profiling shows exposed per-step overhead).
    TE = max(128, ((edge_tile + 127) // 128) * 128)
    while TE > 128 and Np * (2 * TE) * 4 > 12 * 1024 * 1024:
        TE //= 2
    TE = max(128, (TE // 128) * 128)

    n_tiles = max(1, pl.cdiv(E, TE))
    E_pad = n_tiles * TE
    # pad with node-0 self-loops: zeroed by the feature-equality mask and
    # excluded from `deg` -> semantic no-op.
    dst_p = jnp.pad(dst, (0, E_pad - E)).reshape(n_tiles, TE)
    src_p = jnp.pad(src, (0, E_pad - E)).reshape(n_tiles, TE)
    idx = jnp.concatenate([dst_p, src_p], axis=1).reshape(n_tiles, 1, 2 * TE)

    slab = _pack_weight_slab(params)                                  # [6,4,9]

    outT = pl.pallas_call(
        _mpnn_kernel,
        out_shape=jax.ShapeDtypeStruct((4, Np), jnp.float32),
        grid=(n_tiles,),
        in_specs=[
            pl.BlockSpec((4, Np), lambda e: (0, 0)),             # h0T (resident)
            pl.BlockSpec((1, 1, 2 * TE), lambda e: (e, 0, 0)),   # edge-idx tile
            pl.BlockSpec((1, Np), lambda e: (0, 0)),             # 1/deg
            pl.BlockSpec((6, 4, 9), lambda e: (0, 0, 0)),        # packed weights
        ],
        out_specs=pl.BlockSpec((4, Np), lambda e: (0, 0)),
        scratch_shapes=[pltpu.VMEM((4, Np), jnp.float32),        # hT
                        pltpu.VMEM((4, Np), jnp.float32),        # scatter acc
                        pltpu.VMEM((Np, 1), jnp.int32)],         # node-id column
        compiler_params=pltpu.CompilerParams(
            dimension_semantics=("arbitrary",),
            vmem_limit_bytes=32 * 1024 * 1024),
    )(h0T, idx, invdegT, slab)

    # lane-dense slab transposed / cropped back on the host side
    return outT[:out_dim, :N].T                                   # [N, out_dim]


if __name__ == "__main__":
    key = jax.random.PRNGKey(0)
    kp, kv, ke, kw = jax.random.split(key, 4)
    N, E = 8, 16
    pos = jax.random.normal(kp, (N, 2), jnp.float32)
    vel = jax.random.normal(kv, (N, 2), jnp.float32)
    edge_index = jax.random.randint(ke, (2, E), 0, N, dtype=jnp.int32)
    # force one self-loop so the (h_i == h_j) message-masking path is exercised
    edge_index = edge_index.at[:, 0].set(jnp.array([3, 3], dtype=jnp.int32))

    params = init_params(kw)
    out = mpnn_flocking_forward(pos, vel, edge_index, params)
    jax.block_until_ready(out)
    assert out.shape == (N, 2) and out.dtype == jnp.float32
    assert bool(jnp.all(jnp.isfinite(out)))
    print("KERNEL_OK")
</pallas_src>

<mosaic_0001>
module attributes {stable_mosaic.version = 11 : i64} {
  func.func private @main(%arg0: i32) attributes {dimension_semantics = [#tpu.dimension_semantics<core_parallel>], iteration_bounds = array<i64: 2>, tpu.core_type = #tpu.core_type<sc_scalar_subcore>, window_params = []} {
    return
  }
}

module attributes {stable_mosaic.version = 11 : i64} {
  func.func private @main(%arg0: i32) attributes {dimension_semantics = [#tpu.dimension_semantics<core_parallel>], iteration_bounds = array<i64: 2>, tpu.core_type = #tpu.core_type<sc_scalar_subcore>, window_params = []} {
    return
  }
}

module attributes {stable_mosaic.version = 11 : i64} {
  func.func @_mpnn_kernel(%arg0: i32, %arg1: memref<4x128xf32, #tpu.memory_space<vmem>>, %arg2: memref<1x1x512xi32, #tpu.memory_space<vmem>>, %arg3: memref<1x128xf32, #tpu.memory_space<vmem>>, %arg4: memref<6x4x9xf32, #tpu.memory_space<vmem>>, %arg5: memref<4x128xf32, #tpu.memory_space<vmem>>, %arg6: memref<4x128xf32, #tpu.memory_space<vmem>>, %arg7: memref<4x128xf32, #tpu.memory_space<vmem>>, %arg8: memref<128x1xi32, #tpu.memory_space<vmem>>) attributes {dimension_semantics = [#tpu.dimension_semantics<arbitrary>], iteration_bounds = array<i64: 1>, scalar_prefetch = 0 : i64, scratch_operands = 3 : i64, tpu.core_type = #tpu.core_type<tc>, window_params = [{pipeline_mode = #tpu.pipeline_mode<synchronous>, transform_indices = @transform_0, window_bounds = array<i64: 4, 128>}, {transform_indices = @transform_1, window_bounds = array<i64: 1, 1, 512>}, {pipeline_mode = #tpu.pipeline_mode<synchronous>, transform_indices = @transform_2, window_bounds = array<i64: 1, 128>}, {pipeline_mode = #tpu.pipeline_mode<synchronous>, transform_indices = @transform_3, window_bounds = array<i64: 6, 4, 9>}, {pipeline_mode = #tpu.pipeline_mode<synchronous>, transform_indices = @transform_4, window_bounds = array<i64: 4, 128>}]} {
    %c0_i32 = arith.constant 0 : i32
    %0 = arith.cmpi eq, %arg0, %c0_i32 : i32
    %1 = arith.extui %0 : i1 to i32
    %c0_i32_0 = arith.constant 0 : i32
    %2 = arith.cmpi ne, %1, %c0_i32_0 : i32
    scf.if %2 {
      %c0_26 = arith.constant 0 : index
      %c0_27 = arith.constant 0 : index
      %c0_28 = arith.constant 0 : index
      %53 = vector.load %arg4[%c0_26, %c0_27, %c0_28] : memref<6x4x9xf32, #tpu.memory_space<vmem>>, vector<1x4x9xf32>
      %54 = vector.shape_cast %53 : vector<1x4x9xf32> to vector<4x9xf32>
      %55 = vector.extract_strided_slice %54 {offsets = [0, 0], sizes = [4, 4], strides = [1, 1]} : vector<4x9xf32> to vector<4x4xf32>
      %c0_29 = arith.constant 0 : index
      %c0_30 = arith.constant 0 : index
      %56 = vector.load %arg1[%c0_29, %c0_30] : memref<4x128xf32, #tpu.memory_space<vmem>>, vector<4x128xf32>
      %cst_31 = arith.constant dense<0.000000e+00> : vector<4x128xf32>
      %57 = tpu.matmul %55, %56, %cst_31 {dimension_numbers = #tpu.dot_dimension_numbers<[1], [0], [0], [1], [0, 0, 1, 1], [], []>, precision = #tpu.contract_precision<fp32>} : vector<4x4xf32>, vector<4x128xf32>, vector<4x128xf32> -> vector<4x128xf32>
      %58 = vector.extract_strided_slice %54 {offsets = [0, 8], sizes = [4, 1], strides = [1, 1]} : vector<4x9xf32> to vector<4x1xf32>
      %59 = vector.broadcast %58 : vector<4x1xf32> to vector<4x128xf32>
      %60 = arith.addf %57, %59 : vector<4x128xf32>
      %c0_32 = arith.constant 0 : index
      %c0_33 = arith.constant 0 : index
      %61 = vector.load %arg6[%c0_32, %c0_33] : memref<4x128xf32, #tpu.memory_space<vmem>>, vector<4x128xf32>
      tpu.vector_store %arg6[%c0_32, %c0_33], %60 {strides = array<i32>} : memref<4x128xf32, #tpu.memory_space<vmem>>, vector<4x128xf32>,
      %cst_34 = arith.constant 0.000000e+00 : f32
      %62 = vector.broadcast %cst_34 : f32 to vector<4x128xf32>
      %c0_35 = arith.constant 0 : index
      %c0_36 = arith.constant 0 : index
      %63 = vector.load %arg7[%c0_35, %c0_36] : memref<4x128xf32, #tpu.memory_space<vmem>>, vector<4x128xf32>
      tpu.vector_store %arg7[%c0_35, %c0_36], %62 {strides = array<i32>} : memref<4x128xf32, #tpu.memory_space<vmem>>, vector<4x128xf32>,
      %64 = tpu.iota {dimensions = array<i32: 0>} : vector<128x1xi32>
      %c0_37 = arith.constant 0 : index
      %c0_38 = arith.constant 0 : index
      %65 = vector.load %arg8[%c0_37, %c0_38] : memref<128x1xi32, #tpu.memory_space<vmem>>, vector<128x1xi32>
      tpu.vector_store %arg8[%c0_37, %c0_38], %64 {strides = array<i32>} : memref<128x1xi32, #tpu.memory_space<vmem>>, vector<128x1xi32>,
    } else {
    }
    %c0 = arith.constant 0 : index
    %c0_1 = arith.constant 0 : index
    %3 = vector.load %arg6[%c0, %c0_1] : memref<4x128xf32, #tpu.memory_space<vmem>>, vector<4x128xf32>
    %c0_2 = arith.constant 0 : index
    %c0_3 = arith.constant 0 : index
    %c0_4 = arith.constant 0 : index
    %4 = vector.load %arg2[%c0_2, %c0_3, %c0_4] : memref<1x1x512xi32, #tpu.memory_space<vmem>>, vector<1x1x512xi32>
    %5 = vector.shape_cast %4 : vector<1x1x512xi32> to vector<1x512xi32>
    %c0_5 = arith.constant 0 : index
    %c0_6 = arith.constant 0 : index
    %6 = vector.load %arg8[%c0_5, %c0_6] : memref<128x1xi32, #tpu.memory_space<vmem>>, vector<128x1xi32>
    %7 = vector.broadcast %6 : vector<128x1xi32> to vector<128x512xi32>
    %8 = vector.broadcast %5 : vector<1x512xi32> to vector<128x512xi32>
    %9 = arith.cmpi eq, %7, %8 : vector<128x512xi32>
    %cst = arith.constant 1.000000e+00 : f32
    %cst_7 = arith.constant 0.000000e+00 : f32
    %10 = vector.broadcast %cst : f32 to vector<128x512xf32>
    %11 = vector.broadcast %cst_7 : f32 to vector<128x512xf32>
    %12 = arith.select %9, %10, %11 : vector<128x512xi1>, vector<128x512xf32>
    %cst_8 = arith.constant dense<0.000000e+00> : vector<4x512xf32>
    %13 = tpu.matmul %3, %12, %cst_8 {dimension_numbers = #tpu.dot_dimension_numbers<[1], [0], [0], [1], [0, 0, 1, 1], [], []>, precision = #tpu.contract_precision<fp32>} : vector<4x128xf32>, vector<128x512xf32>, vector<4x512xf32> -> vector<4x512xf32>
    %14 = vector.extract_strided_slice %13 {offsets = [0, 0], sizes = [4, 256], strides = [1, 1]} : vector<4x512xf32> to vector<4x256xf32>
    %15 = vector.extract_strided_slice %13 {offsets = [0, 256], sizes = [4, 256], strides = [1, 1]} : vector<4x512xf32> to vector<4x256xf32>
    %c1 = arith.constant 1 : index
    %c0_9 = arith.constant 0 : index
    %c0_10 = arith.constant 0 : index
    %16 = vector.load %arg4[%c1, %c0_9, %c0_10] : memref<6x4x9xf32, #tpu.memory_space<vmem>>, vector<1x4x9xf32>
    %17 = vector.shape_cast %16 : vector<1x4x9xf32> to vector<4x9xf32>
    %c2 = arith.constant 2 : index
    %c0_11 = arith.constant 0 : index
    %c0_12 = arith.constant 0 : index
    %18 = vector.load %arg4[%c2, %c0_11, %c0_12] : memref<6x4x9xf32, #tpu.memory_space<vmem>>, vector<1x4x9xf32>
    %19 = vector.shape_cast %18 : vector<1x4x9xf32> to vector<4x9xf32>
    %20 = vector.extract_strided_slice %17 {offsets = [0, 0], sizes = [4, 4], strides = [1, 1]} : vector<4x9xf32> to vector<4x4xf32>
    %cst_13 = arith.constant dense<0.000000e+00> : vector<4x256xf32>
    %21 = tpu.matmul %20, %14, %cst_13 {dimension_numbers = #tpu.dot_dimension_numbers<[1], [0], [0], [1], [0, 0, 1, 1], [], []>} : vector<4x4xf32>, vector<4x256xf32>, vector<4x256xf32> -> vector<4x256xf32>
    %22 = vector.extract_strided_slice %17 {offsets = [0, 4], sizes = [4, 4], strides = [1, 1]} : vector<4x9xf32> to vector<4x4xf32>
    %cst_14 = arith.constant dense<0.000000e+00> : vector<4x256xf32>
    %23 = tpu.matmul %22, %15, %cst_14 {dimension_numbers = #tpu.dot_dimension_numbers<[1], [0], [0], [1], [0, 0, 1, 1], [], []>} : vector<4x4xf32>, vector<4x256xf32>, vector<4x256xf32> -> vector<4x256xf32>
    %24 = arith.addf %21, %23 : vector<4x256xf32>
    %25 = vector.extract_strided_slice %17 {offsets = [0, 8], sizes = [4, 1], strides = [1, 1]} : vector<4x9xf32> to vector<4x1xf32>
    %26 = vector.broadcast %25 : vector<4x1xf32> to vector<4x256xf32>
    %27 = arith.addf %24, %26 : vector<4x256xf32>
    %28 = math.tanh %27 : vector<4x256xf32>
    %29 = vector.extract_strided_slice %19 {offsets = [0, 0], sizes = [4, 4], strides = [1, 1]} : vector<4x9xf32> to vector<4x4xf32>
    %cst_15 = arith.constant dense<0.000000e+00> : vector<4x256xf32>
    %30 = tpu.matmul %29, %28, %cst_15 {dimension_numbers = #tpu.dot_dimension_numbers<[1], [0], [0], [1], [0, 0, 1, 1], [], []>} : vector<4x4xf32>, vector<4x256xf32>, vector<4x256xf32> -> vector<4x256xf32>
    %31 = vector.extract_strided_slice %19 {offsets = [0, 8], sizes = [4, 1], strides = [1, 1]} : vector<4x9xf32> to vector<4x1xf32>
    %32 = vector.broadcast %31 : vector<4x1xf32> to vector<4x256xf32>
    %33 = arith.addf %30, %32 : vector<4x256xf32>
    %34 = math.tanh %33 : vector<4x256xf32>
    %35 = arith.subf %14, %15 : vector<4x256xf32>
    %36 = math.absf %35 : vector<4x256xf32>
    %cst_16 = arith.constant dense<0xFF800000> : vector<256xf32>
    %37 = vector.multi_reduction <maximumf>, %36, %cst_16 [0] : vector<4x256xf32> to vector<256xf32>
    %38 = vector.shape_cast %37 : vector<256xf32> to vector<1x256xf32>
    %cst_17 = arith.constant 0.000000e+00 : f32
    %39 = vector.broadcast %cst_17 : f32 to vector<1x256xf32>
    %40 = arith.cmpf oeq, %38, %39 : vector<1x256xf32>
    %cst_18 = arith.constant 0.000000e+00 : f32
    %41 = vector.shape_cast %40 : vector<1x256xi1> to vector<1x256xi1>
    %42 = vector.broadcast %41 : vector<1x256xi1> to vector<4x256xi1>
    %43 = vector.broadcast %cst_18 : f32 to vector<4x256xf32>
    %44 = arith.select %42, %43, %34 : vector<4x256xi1>, vector<4x256xf32>
    %45 = vector.extract_strided_slice %12 {offsets = [0, 0], sizes = [128, 256], strides = [1, 1]} : vector<128x512xf32> to vector<128x256xf32>
    %c0_19 = arith.constant 0 : index
    %c0_20 = arith.constant 0 : index
    %46 = vector.load %arg7[%c0_19, %c0_20] : memref<4x128xf32, #tpu.memory_space<vmem>>, vector<4x128xf32>
    %cst_21 = arith.constant dense<0.000000e+00> : vector<4x128xf32>
    %47 = tpu.matmul %44, %45, %cst_21 {dimension_numbers = #tpu.dot_dimension_numbers<[1], [1], [0], [0], [0, 0, 1, 0], [], []>} : vector<4x256xf32>, vector<128x256xf32>, vector<4x128xf32> -> vector<4x128xf32>
    %48 = arith.addf %46, %47 : vector<4x128xf32>
    %c0_22 = arith.constant 0 : index
    %c0_23 = arith.constant 0 : index
    %49 = vector.load %arg7[%c0_22, %c0_23] : memref<4x128xf32, #tpu.memory_space<vmem>>, vector<4x128xf32>
    tpu.vector_store %arg7[%c0_22, %c0_23], %48 {strides = array<i32>} : memref<4x128xf32, #tpu.memory_space<vmem>>, vector<4x128xf32>,
    %c0_i32_24 = arith.constant 0 : i32
    %50 = arith.cmpi eq, %arg0, %c0_i32_24 : i32
    %51 = arith.extui %50 : i1 to i32
    %c0_i32_25 = arith.constant 0 : i32
    %52 = arith.cmpi ne, %51, %c0_i32_25 : i32
    scf.if %52 {
      %c0_26 = arith.constant 0 : index
      %c0_27 = arith.constant 0 : index
      %53 = vector.load %arg7[%c0_26, %c0_27] : memref<4x128xf32, #tpu.memory_space<vmem>>, vector<4x128xf32>
      %54 = tpu.iota {dimensions = array<i32: 0>} : vector<4x128xi32>
      %c2_i32 = arith.constant 2 : i32
      %55 = vector.broadcast %c2_i32 : i32 to vector<4x128xi32>
      %56 = arith.cmpi sge, %54, %55 : vector<4x128xi32>
      %c0_28 = arith.constant 0 : index
      %c0_29 = arith.constant 0 : index
      %57 = vector.load %arg3[%c0_28, %c0_29] : memref<1x128xf32, #tpu.memory_space<vmem>>, vector<1x128xf32>
      %cst_30 = arith.constant 1.000000e+00 : f32
      %58 = vector.shape_cast %57 : vector<1x128xf32> to vector<1x128xf32>
      %59 = vector.broadcast %58 : vector<1x128xf32> to vector<4x128xf32>
      %60 = vector.broadcast %cst_30 : f32 to vector<4x128xf32>
      %61 = arith.select %56, %59, %60 : vector<4x128xi1>, vector<4x128xf32>
      %62 = arith.mulf %53, %61 : vector<4x128xf32>
      %c3 = arith.constant 3 : index
      %c0_31 = arith.constant 0 : index
      %c0_32 = arith.constant 0 : index
      %63 = vector.load %arg4[%c3, %c0_31, %c0_32] : memref<6x4x9xf32, #tpu.memory_space<vmem>>, vector<1x4x9xf32>
      %64 = vector.shape_cast %63 : vector<1x4x9xf32> to vector<4x9xf32>
      %c4 = arith.constant 4 : index
      %c0_33 = arith.constant 0 : index
      %c0_34 = arith.constant 0 : index
      %65 = vector.load %arg4[%c4, %c0_33, %c0_34] : memref<6x4x9xf32, #tpu.memory_space<vmem>>, vector<1x4x9xf32>
      %66 = vector.shape_cast %65 : vector<1x4x9xf32> to vector<4x9xf32>
      %c5 = arith.constant 5 : index
      %c0_35 = arith.constant 0 : index
      %c0_36 = arith.constant 0 : index
      %67 = vector.load %arg4[%c5, %c0_35, %c0_36] : memref<6x4x9xf32, #tpu.memory_space<vmem>>, vector<1x4x9xf32>
      %68 = vector.shape_cast %67 : vector<1x4x9xf32> to vector<4x9xf32>
      %69 = vector.extract_strided_slice %64 {offsets = [0, 0], sizes = [4, 4], strides = [1, 1]} : vector<4x9xf32> to vector<4x4xf32>
      %cst_37 = arith.constant dense<0.000000e+00> : vector<4x128xf32>
      %70 = tpu.matmul %69, %3, %cst_37 {dimension_numbers = #tpu.dot_dimension_numbers<[1], [0], [0], [1], [0, 0, 1, 1], [], []>, precision = #tpu.contract_precision<fp32>} : vector<4x4xf32>, vector<4x128xf32>, vector<4x128xf32> -> vector<4x128xf32>
      %71 = vector.extract_strided_slice %64 {offsets = [0, 4], sizes = [4, 4], strides = [1, 1]} : vector<4x9xf32> to vector<4x4xf32>
      %cst_38 = arith.constant dense<0.000000e+00> : vector<4x128xf32>
      %72 = tpu.matmul %71, %62, %cst_38 {dimension_numbers = #tpu.dot_dimension_numbers<[1], [0], [0], [1], [0, 0, 1, 1], [], []>, precision = #tpu.contract_precision<fp32>} : vector<4x4xf32>, vector<4x128xf32>, vector<4x128xf32> -> vector<4x128xf32>
      %73 = arith.addf %70, %72 : vector<4x128xf32>
      %74 = vector.extract_strided_slice %64 {offsets = [0, 8], sizes = [4, 1], strides = [1, 1]} : vector<4x9xf32> to vector<4x1xf32>
      %75 = vector.broadcast %74 : vector<4x1xf32> to vector<4x128xf32>
      %76 = arith.addf %73, %75 : vector<4x128xf32>
      %77 = math.tanh %76 : vector<4x128xf32>
      %78 = vector.extract_strided_slice %66 {offsets = [0, 0], sizes = [4, 4], strides = [1, 1]} : vector<4x9xf32> to vector<4x4xf32>
      %cst_39 = arith.constant dense<0.000000e+00> : vector<4x128xf32>
      %79 = tpu.matmul %78, %77, %cst_39 {dimension_numbers = #tpu.dot_dimension_numbers<[1], [0], [0], [1], [0, 0, 1, 1], [], []>, precision = #tpu.contract_precision<fp32>} : vector<4x4xf32>, vector<4x128xf32>, vector<4x128xf32> -> vector<4x128xf32>
      %80 = vector.extract_strided_slice %66 {offsets = [0, 8], sizes = [4, 1], strides = [1, 1]} : vector<4x9xf32> to vector<4x1xf32>
      %81 = vector.broadcast %80 : vector<4x1xf32> to vector<4x128xf32>
      %82 = arith.addf %79, %81 : vector<4x128xf32>
      %83 = math.tanh %82 : vector<4x128xf32>
      %84 = vector.extract_strided_slice %68 {offsets = [0, 0], sizes = [4, 4], strides = [1, 1]} : vector<4x9xf32> to vector<4x4xf32>
      %cst_40 = arith.constant dense<0.000000e+00> : vector<4x128xf32>
      %85 = tpu.matmul %84, %83, %cst_40 {dimension_numbers = #tpu.dot_dimension_numbers<[1], [0], [0], [1], [0, 0, 1, 1], [], []>, precision = #tpu.contract_precision<fp32>} : vector<4x4xf32>, vector<4x128xf32>, vector<4x128xf32> -> vector<4x128xf32>
      %86 = vector.extract_strided_slice %68 {offsets = [0, 8], sizes = [4, 1], strides = [1, 1]} : vector<4x9xf32> to vector<4x1xf32>
      %87 = vector.broadcast %86 : vector<4x1xf32> to vector<4x128xf32>
      %88 = arith.addf %85, %87 : vector<4x128xf32>
      %c0_41 = arith.constant 0 : index
      %c0_42 = arith.constant 0 : index
      %89 = vector.load %arg5[%c0_41, %c0_42] : memref<4x128xf32, #tpu.memory_space<vmem>>, vector<4x128xf32>
      tpu.vector_store %arg5[%c0_41, %c0_42], %88 {strides = array<i32>} : memref<4x128xf32, #tpu.memory_space<vmem>>, vector<4x128xf32>,
    } else {
    }
    return
  }
  func.func @transform_0(%arg0: i32) -> (i32, i32) {
    %c0_i32 = arith.constant 0 : i32
    %c0_i32_0 = arith.constant 0 : i32
    %c0_i32_1 = arith.constant 0 : i32
    return %c0_i32, %c0_i32_0 : i32, i32
  }
  func.func @transform_1(%arg0: i32) -> (i32, i32, i32) {
    %c0_i32 = arith.constant 0 : i32
    %c0_i32_0 = arith.constant 0 : i32
    %c0_i32_1 = arith.constant 0 : i32
    return %arg0, %c0_i32, %c0_i32_0 : i32, i32, i32
  }
  func.func @transform_2(%arg0: i32) -> (i32, i32) {
    %c0_i32 = arith.constant 0 : i32
    %c0_i32_0 = arith.constant 0 : i32
    %c0_i32_1 = arith.constant 0 : i32
    return %c0_i32, %c0_i32_0 : i32, i32
  }
  func.func @transform_3(%arg0: i32) -> (i32, i32, i32) {
    %c0_i32 = arith.constant 0 : i32
    %c0_i32_0 = arith.constant 0 : i32
    %c0_i32_1 = arith.constant 0 : i32
    %c0_i32_2 = arith.constant 0 : i32
    return %c0_i32, %c0_i32_0, %c0_i32_1 : i32, i32, i32
  }
  func.func @transform_4(%arg0: i32) -> (i32, i32) {
    %c0_i32 = arith.constant 0 : i32
    %c0_i32_0 = arith.constant 0 : i32
    %c0_i32_1 = arith.constant 0 : i32
    return %c0_i32, %c0_i32_0 : i32, i32
  }
}

</mosaic_0001>

<bundles_post_ra>
// kernel: mpnn_flocking_forward.1
= control target key start
LH: loop header
LB: loop body
LE: loop exit
PB: predicated region body
PF: predicated region fallthrough
CT: control target
= control target key end

     0   :  { %vm6918_vm0 = vcmask 1043456   ;;  %vm6917_vm1 = vcmask 31744   ;;  %v6951_v0 = vmov 0.0   ;;  %vm6915_vm2 = vmmov 0   ;;  %s4747_s21 = smov 124   ;;  %s6910_s0 = inlined_call_operand.vmem [shape: f32[4,128], index: 0, kind: input, shape index: {}]   ;;  %s6911_s3 = inlined_call_operand.vmem [shape: f32[6,4,9], index: 3, kind: input, shape index: {}]   ;;  %s6912_s1 = inlined_call_operand.vmem [shape: s32[1,1,512], index: 1, kind: input, shape index: {}]   ;;  %s6913_s2 = inlined_call_operand.vmem [shape: f32[1,128], index: 2, kind: input, shape index: {}]   ;;  %s6914_s4 = inlined_call_operand.vmem [shape: f32[4,128], index: 4, kind: output, shape index: {}]  }
   0x1   :  { %4567 = vmatprep.subr.mxu0 %v6951_v0  ;;  %482 = vst [vmem:[#allocation3] sm:$0xf] %v6951_v0  ;;  %v22_v1 = vld [vmem:[%s6910_s0] sm:$0xf]  ;;  %4569 = vmatprep.mubr.msk.f32.mxu0 %vm6915_vm2, %v6951_v0  ;;  %v483_v3 = vlaneseq  ;;  %v4744_v8 = vmov 0   ;;  %vm500_vm3 = vcmask 7168  }
   0x2   :  { %v4783_v2 = vld [vmem:[%s6911_s3] sm:$0xf]  ;;  %v33_v4 = vsel %vm6918_vm0, %v22_v1, 0  ;;  %4572 = vmatprep.subr.mxu1 %v6951_v0  ;;  %4574 = vmatprep.mubr.msk.f32.mxu1 %vm6915_vm2, %v6951_v0  ;;  %v4745_v40 = vmov 8   ;;  %v7148_v61 = vmov 0  ;;  %v7151_v62 = vmov 0 }
   0x3   :  { %v29_v5 = vsel %vm6917_vm1, %v4783_v2, 0  ;;  %v4791_v6 = vand.u32 4294901760, %v33_v4  ;;  %4724 = vset.pattern.permute.xlu1 %v4744_v8  ;;  %v4796_v9 = vshrl.u32 %v483_v3, 7  ;;  %4723 = vset.pattern.permute.xlu0 %v4744_v8  ;;  %v518_v54 = vld [vmem:[%s6912_s1] sm:$0xf]  ;;  %v6943_v63 = vmov 1.0  }
   0x4   :  { %v4793_v7 = vand.u32 4294901760, %v29_v5  ;;  %v7156_v3 = vmov 0 }
   0x5   :  { %7143 = vst [vmem:[#allocation5_spill] sm:$0xff] %v4796_v9  ;;  %4568 = vmatpush3.msra.mxu0 %v4791_v6  ;;  %v143_v11 = vsub.f32 %v33_v4, %v4791_v6  ;;  %v497_v12 = vadd.s32 104, %v4796_v9  ;;  %501 = vst.msk [vmem:[#allocation4] sm:$0xff] %vm500_vm3, %v4796_v9  ;;  %v499_v13 = vadd.s32 120, %v4796_v9  ;;  %v496_v14 = vadd.s32 96, %v4796_v9 }
   0x6   :  { %v102_v10 = vsub.f32 %v29_v5, %v4793_v7  ;;  %4577 = vmatprep.subr.mxu0 %v6951_v0  ;;  %v498_v15 = vadd.s32 112, %v4796_v9  ;;  %v494_v16 = vadd.s32 80, %v4796_v9  ;;  %v495_v17 = vadd.s32 88, %v4796_v9 }
   0x7   :  { %v144_v19 = vand.u32 4294901760, %v143_v11  ;;  %514 = vst.msk [vmem:[#allocation4 + $0x68] sm:$0xff] %vm500_vm3, %v497_v12  ;;  %516 = vst.msk [vmem:[#allocation4 + $0x78] sm:$0xff] %vm500_vm3, %v499_v13  ;;  %v493_v20 = vadd.s32 72, %v4796_v9  ;;  %v492_v21 = vadd.s32 64, %v4796_v9  ;;  %v490_v22 = vadd.s32 48, %v4796_v9 }
   0x8   :  { %v103_v18 = vand.u32 4294901760, %v102_v10  ;;  %513 = vst.msk [vmem:[#allocation4 + $0x60] sm:$0xff] %vm500_vm3, %v496_v14  ;;  %515 = vst.msk [vmem:[#allocation4 + $0x70] sm:$0xff] %vm500_vm3, %v498_v15  ;;  %v491_v23 = vadd.s32 56, %v4796_v9  ;;  %v489_v24 = vadd.s32 40, %v4796_v9  ;;  %v488_v25 = vadd.s32 32, %v4796_v9 }
   0x9   :  { %511 = vst.msk [vmem:[#allocation4 + $0x50] sm:$0xff] %vm500_vm3, %v494_v16  ;;  %512 = vst.msk [vmem:[#allocation4 + $0x58] sm:$0xff] %vm500_vm3, %v495_v17  ;;  %v145_v27 = vsub.f32 %v143_v11, %v144_v19  ;;  %v487_v28 = vadd.s32 24, %v4796_v9  ;;  %v486_v29 = vadd.s32 16, %v4796_v9  ;;  %v485_v30 = vadd.s32 8, %v4796_v9 }
   0xa   :  { %v104_v26 = vsub.f32 %v102_v10, %v103_v18  ;;  %510 = vst.msk [vmem:[#allocation4 + $0x48] sm:$0xff] %vm500_vm3, %v493_v20  ;;  %509 = vst.msk [vmem:[#allocation4 + $0x40] sm:$0xff] %vm500_vm3, %v492_v21  ;;  %v593_v50 = vsub.s32 2, %v4796_v9  ;;  %v597_v51 = vsub.s32 3, %v4796_v9  ;;  %v589_v52 = vsub.s32 1, %v4796_v9 }
   0xb   :  { %507 = vst.msk [vmem:[#allocation4 + $0x30] sm:$0xff] %vm500_vm3, %v490_v22  ;;  %508 = vst.msk [vmem:[#allocation4 + $0x38] sm:$0xff] %vm500_vm3, %v491_v23  ;;  %v146_v32 = vand.u32 4294901760, %v145_v27  ;;  %v585_v53 = vsub.s32 0, %v4796_v9  ;;  %v7159_v4 = vmov 0  ;;  %v7170_v13 = vmov 0 }
   0xc   :  { %506 = vst.msk [vmem:[#allocation4 + $0x28] sm:$0xff] %vm500_vm3, %v489_v24  ;;  %505 = vst.msk [vmem:[#allocation4 + $0x20] sm:$0xff] %vm500_vm3, %v488_v25  ;;  %v105_v31 = vand.u32 4294901760, %v104_v26  ;;  %v519_v48 = vld [vmem:[#allocation4] sm:$0xff]  ;;  %v4862_v55 = vrot.slane %v518_v54, %v593_v50  ;;  %v4864_v56 = vrot.slane %v518_v54, %v597_v51  ;;  %v4866_v57 = vrot.slane %v518_v54, %v589_v52 }
   0xd   :  { %504 = vst.msk [vmem:[#allocation4 + $0x18] sm:$0xff] %vm500_vm3, %v487_v28  ;;  %503 = vst.msk [vmem:[#allocation4 + $0x10] sm:$0xff] %vm500_vm3, %v486_v29  ;;  %4573 = vmatpush3.msra.mxu1 %v146_v32  ;;  %v4868_v58 = vrot.slane %v518_v54, %v585_v53  ;;  %v7173_v15 = vmov 0  ;;  %v7184_v22 = vmov 0  ;;  %v7187_v25 = vmov 0 }
   0xe   :  { %502 = vst.msk [vmem:[#allocation4 + $0x8] sm:$0xff] %vm500_vm3, %v485_v30  ;;  %4570 = vmatmul.mubr.f32.vlgmr.msra.gmra.mxu0 %v105_v31  ;;  %4575 = vmatmul.mubr.f32.vlgmr.msra.gmra.mxu1 %v4793_v7  ;;  %v532_v33 = vld [vmem:[#allocation4 + $0x68] sm:$0xff]  ;;  %v534_v34 = vld [vmem:[#allocation4 + $0x78] sm:$0xff]  ;;  %7144 = vst [vmem:[#allocation6_spill] sm:$0xff] %v4862_v55  ;;  %v7191_v30 = vmov 0  ;;  %v7205_v53 = vmov 0 }
   0xf   :  { %4578 = vmatpush3.msra.mxu0 %v143_v11  ;;  %4579 = vmatprep.mubr.msk.f32.mxu0 %vm6915_vm2, %v6951_v0  ;;  %v531_v35 = vld [vmem:[#allocation4 + $0x60] sm:$0xff]  ;;  %v533_v36 = vld [vmem:[#allocation4 + $0x70] sm:$0xff]  ;;  %7145 = vst [vmem:[#allocation7_spill] sm:$0xff] %v4864_v56  ;;  %v7167_v11 = vmov 0  ;;  %v7233_v9 = vmov 0.0  }
  0x10   :  { %4582 = vmatprep.subr.mxu1 %v6951_v0  ;;  %4584 = vmatprep.mubr.msk.f32.mxu1 %vm6915_vm2, %v6951_v0  ;;  %v529_v37 = vld [vmem:[#allocation4 + $0x50] sm:$0xff]  ;;  %v530_v38 = vld [vmem:[#allocation4 + $0x58] sm:$0xff] }
  0x11   :  { %4583 = vmatpush3.msra.mxu1 %v4791_v6  ;;  %4587 = vmatprep.subr.mxu0 %v6951_v0  ;;  %v528_v39 = vld [vmem:[#allocation4 + $0x48] sm:$0xff]  ;;  %v527_v41 = vld [vmem:[#allocation4 + $0x40] sm:$0xff] }
  0x12   :  { %4580 = vmatmul.mubr.f32.vlgmr.msra.gmra.mxu0 %v102_v10  ;;  %4585 = vmatmul.mubr.f32.vlgmr.msra.gmra.mxu1 %v103_v18  ;;  %v526_v42 = vld [vmem:[#allocation4 + $0x38] sm:$0xff]  ;;  %v525_v43 = vld [vmem:[#allocation4 + $0x30] sm:$0xff]  ;;  %v7177_v18 = vmov 0 }
  0x13   :  { %4588 = vmatpush3.msra.mxu0 %v144_v19  ;;  %4589 = vmatprep.mubr.msk.f32.mxu0 %vm6915_vm2, %v6951_v0  ;;  %v523_v44 = vld [vmem:[#allocation4 + $0x20] sm:$0xff]  ;;  %v524_v45 = vld [vmem:[#allocation4 + $0x28] sm:$0xff]  ;;  %v7180_v19 = vmov 0 }
  0x14   :  { %4592 = vmatprep.subr.mxu1 %v6951_v0  ;;  %4594 = vmatprep.mubr.msk.f32.mxu1 %vm6915_vm2, %v6951_v0  ;;  %v521_v46 = vld [vmem:[#allocation4 + $0x10] sm:$0xff]  ;;  %v522_v47 = vld [vmem:[#allocation4 + $0x18] sm:$0xff] }
  0x15   :  { %4593 = vmatpush3.msra.mxu1 %v4791_v6  ;;  %575 = vperm.xlu1 %4724, %v532_v33   ;;  %v520_v49 = vld [vmem:[#allocation4 + $0x8] sm:$0xff]  ;;  %v7194_v33 = vmov 0 }
  0x16   :  { %4590 = vmatmul.mubr.f32.vlgmr.msra.gmra.mxu0 %v4793_v7  ;;  %4595 = vmatmul.mubr.f32.vlgmr.msra.gmra.mxu1 %v4793_v7  ;;  %v7163_v7 = vmov 0 }
  0x17   :  { %581 = vperm.xlu0 %4723, %v534_v34   ;;  %995 = vmatprep.mubr.f32.mxu1 %v6951_v0 }
  0x18   :  { %791 = vmatprep.mubr.f32.mxu0 %v6951_v0 }
  0x19   :  { %572 = vperm.xlu1 %4724, %v531_v35  }
  0x1b   :  { %578 = vperm.xlu0 %4723, %v533_v36  }
  0x1d   :  { %566 = vperm.xlu1 %4724, %v529_v37   ;;  %v7197_v37 = vmov 0 }
  0x1f   :  { %569 = vperm.xlu0 %4723, %v530_v38  }
  0x21   :  { %563 = vperm.xlu1 %4724, %v528_v39  }
  0x23   :  { %4725 = vset.pattern.permute.xlu0 %v4745_v40 }
  0x24   :  { %25 = vperm.xlu0 %4725, %v4783_v2  }
  0x25   :  { %560 = vperm.xlu1 %4724, %v527_v41   ;;  %v7200_v41 = vmov 0 }
  0x28   :  { %4726 = vset.pattern.permute.xlu0 %v4744_v8 }
  0x29   :  { %557 = vperm.xlu0 %4726, %v526_v42   ;;  %554 = vperm.xlu1 %4724, %v525_v43  }
  0x2d   :  { %548 = vperm.xlu0 %4726, %v523_v44   ;;  %551 = vperm.xlu1 %4724, %v524_v45  }
  0x31   :  { %542 = vperm.xlu0 %4726, %v521_v46   ;;  %545 = vperm.xlu1 %4724, %v522_v47  }
  0x35   :  { %536 = vperm.xlu0 %4726, %v519_v48   ;;  %539 = vperm.xlu1 %4724, %v520_v49  }
  0x39   :  { %4727 = vset.pattern.permute.xlu0 %v4745_v40  ;;  %4728 = vset.pattern.permute.xlu1 %v4745_v40 }
  0x90   :  { %v4870_v59 = vpop.permute.xlu1 %575 }
  0x91   :  { %7146 = vst [vmem:[#allocation8_spill] sm:$0xff] %v4870_v59  ;;  %vm4934_vm3 = vcmp.eq.s32.totalorder %v4870_v59, %v4866_v57  ;;  %vm4948_vm2 = vcmp.eq.s32.totalorder %v4870_v59, %v4868_v58 }
  0x92   :  { %v4876_v60 = vpop.permute.xlu0 %581  ;;  %v7164_v7 = vsel %vm4934_vm3, 4294967295, %v7163_v7  ;;  %v7168_v11 = vsel %vm4948_vm2, 4294967295, %v7167_v11  ;;  %v716_v31 = vsel %vm4934_vm3, 1.0, %v6951_v0  ;;  %v715_v32 = vsel %vm4948_vm2, 1.0, %v6951_v0 }
  0x93   :  { %7147 = vst [vmem:[#allocation9_spill] sm:$0xff] %v4876_v60  ;;  %vm4880_vm6 = vcmp.eq.s32.totalorder %v4876_v60, %v4866_v57  ;;  %vm4886_vm7 = vcmp.eq.s32.totalorder %v4876_v60, %v4868_v58  ;;  %7165 = vst [vmem:[#allocation17_spill] sm:$0xff] %v7164_v7  ;;  %v5100_v43 = vsub.f32 %v716_v31, %v716_v31 }
  0x94   :  { %v7149_v61 = vsel %vm4880_vm6, 4294967295, %v7148_v61  ;;  %v7152_v62 = vsel %vm4886_vm7, 4294967295, %v7151_v62  ;;  %4264 = vmatprep.subr.msk.mxu0 %vm4880_vm6, %v6943_v63  ;;  %v4897_v1 = vpop.permute.xlu1 %572  ;;  %v723_v5 = vsel %vm4886_vm7, 1.0, %v6951_v0  ;;  %7169 = vst [vmem:[#allocation19_spill] sm:$0xff] %v7168_v11  ;;  %v724_v14 = vsel %vm4880_vm6, 1.0, %v6951_v0 }
  0x95   :  { %7150 = vst [vmem:[#allocation10_spill] sm:$0xff] %v7149_v61  ;;  %7153 = vst [vmem:[#allocation11_spill] sm:$0xff] %v7152_v62  ;;  %4265 = vmatpush1.msk.msra.mxu0 %vm4886_vm7, %v6943_v63  ;;  %v4959_v12 = vsub.f32 %v723_v5, %v723_v5  ;;  %vm4963_vm11 = vcmp.eq.s32.totalorder %v4897_v1, %v4866_v57  ;;  %vm4977_vm0 = vcmp.eq.s32.totalorder %v4897_v1, %v4868_v58  ;;  %v7208_v5 = vmov 0 }
  0x96   :  { %7154 = vst [vmem:[#allocation12_spill] sm:$0xff] %v4897_v1  ;;  %v4902_v2 = vpop.permute.xlu0 %578  ;;  %v7171_v13 = vsel %vm4963_vm11, 4294967295, %v7170_v13  ;;  %v7174_v15 = vsel %vm4977_vm0, 4294967295, %v7173_v15  ;;  %v5009_v20 = vsub.f32 %v724_v14, %v724_v14  ;;  %v711_v36 = vsel %vm4977_vm0, 1.0, %v6951_v0 }
  0x97   :  { %7155 = vst [vmem:[#allocation13_spill] sm:$0xff] %v4902_v2  ;;  %vm4910_vm12 = vcmp.eq.s32.totalorder %v4902_v2, %v4868_v58  ;;  %vm4916_vm13 = vcmp.eq.s32.totalorder %v4902_v2, %v4866_v57  ;;  %7172 = vst [vmem:[#allocation20_spill] sm:$0xff] %v7171_v13  ;;  %v6941_v23 = vand.u32 4294901760, %v4959_v12  ;;  %v5109_v46 = vsub.f32 %v715_v32, %v715_v32 }
  0x98   :  { %v7157_v3 = vsel %vm4910_vm12, 4294967295, %v7156_v3  ;;  %v7160_v4 = vsel %vm4916_vm13, 4294967295, %v7159_v4  ;;  %v4927_v6 = vpop.permute.xlu1 %566  ;;  %4266 = vmatprep.subr.msk.mxu0 %vm4916_vm13, %v6943_v63  ;;  %v719_v8 = vsel %vm4910_vm12, 1.0, %v6951_v0  ;;  %7175 = vst [vmem:[#allocation21_spill] sm:$0xff] %v7174_v15  ;;  %7183 = vst [vmem:[#allocation25_spill] sm:$0xff] %v5009_v20  ;;  %v720_v24 = vsel %vm4916_vm13, 1.0, %v6951_v0 }
  0x99   :  { %7158 = vst [vmem:[#allocation14_spill] sm:$0xff] %v7157_v3  ;;  %7161 = vst [vmem:[#allocation15_spill] sm:$0xff] %v7160_v4  ;;  %4267 = vmatpush1.msk.msra.mxu0 %vm4910_vm12, %v6943_v63  ;;  %v4981_v16 = vsub.f32 %v719_v8, %v719_v8  ;;  %vm5018_vm10 = vcmp.eq.s32.totalorder %v4927_v6, %v4866_v57  ;;  %vm5031_vm14 = vcmp.eq.s32.totalorder %v4927_v6, %v4868_v58  ;;  %v7211_v8 = vmov 0 }
  0x9a   :  { %7162 = vst [vmem:[#allocation16_spill] sm:$0xff] %v4927_v6  ;;  %v4941_v10 = vpop.permute.xlu0 %569  ;;  %4268 = vmatprep.subr.msk.mxu0 %vm4934_vm3, %v6943_v63  ;;  %v7185_v22 = vsel %vm5018_vm10, 4294967295, %v7184_v22  ;;  %v7188_v25 = vsel %vm5031_vm14, 4294967295, %v7187_v25  ;;  %v6942_v26 = vand.u32 4294901760, %v5009_v20  ;;  %v5038_v28 = vsub.f32 %v720_v24, %v720_v24 }
  0x9b   :  { %7166 = vst [vmem:[#allocation18_spill] sm:$0xff] %v4941_v10  ;;  %4269 = vmatpush1.msk.msra.mxu0 %vm4948_vm2, %v6943_v63  ;;  %vm4992_vm5 = vcmp.eq.s32.totalorder %v4941_v10, %v4866_v57  ;;  %vm5001_vm15 = vcmp.eq.s32.totalorder %v4941_v10, %v4868_v58  ;;  %7186 = vst [vmem:[#allocation26_spill] sm:$0xff] %v7185_v22  ;;  %v6938_v29 = vand.u32 4294901760, %v4981_v16  ;;  %v6937_v49 = vand.u32 4294901760, %v5100_v43 }
  0x9c   :  { %v4985_v17 = vpop.permute.xlu1 %563  ;;  %4270 = vmatprep.subr.msk.mxu0 %vm4963_vm11, %v6943_v63  ;;  %v7178_v18 = vsel %vm4992_vm5, 4294967295, %v7177_v18  ;;  %v7181_v19 = vsel %vm5001_vm15, 4294967295, %v7180_v19  ;;  %7189 = vst [vmem:[#allocation27_spill] sm:$0xff] %v7188_v25  ;;  %v805_v34 = vsub.f32 %v5009_v20, %v6942_v26  ;;  %v810_v35 = vsub.f32 %v4959_v12, %v6941_v23 }
  0x9d   :  { %7176 = vst [vmem:[#allocation22_spill] sm:$0xff] %v4985_v17  ;;  %7179 = vst [vmem:[#allocation23_spill] sm:$0xff] %v7178_v18  ;;  %4271 = vmatpush1.msk.msra.mxu0 %vm4977_vm0, %v6943_v63  ;;  %vm5046_vm1 = vcmp.eq.s32.totalorder %v4985_v17, %v4866_v57  ;;  %vm5065_vm4 = vcmp.eq.s32.totalorder %v4985_v17, %v4868_v58  ;;  %v6940_v38 = vand.u32 4294901760, %v5038_v28  ;;  %v707_v51 = vsel %vm5001_vm15, 1.0, %v6951_v0 }
  0x9e   :  { %7182 = vst [vmem:[#allocation24_spill] sm:$0xff] %v7181_v19  ;;  %4272 = vmatprep.subr.msk.mxu0 %vm4992_vm5, %v6943_v63  ;;  %v7192_v30 = vsel %vm5046_vm1, 4294967295, %v7191_v30  ;;  %v7195_v33 = vsel %vm5065_vm4, 4294967295, %v7194_v33  ;;  %v820_v39 = vsub.f32 %v4981_v16, %v6938_v29  ;;  %v806_v40 = vand.u32 4294901760, %v805_v34 }
  0x9f   :  { %v5011_v21 = vpop.permute.xlu0 %25  ;;  %4273 = vmatpush1.msk.msra.mxu0 %vm5001_vm15, %v6943_v63  ;;  %7193 = vst [vmem:[#allocation29_spill] sm:$0xff] %v7192_v30  ;;  %7196 = vst [vmem:[#allocation30_spill] sm:$0xff] %v7195_v33  ;;  %v811_v42 = vand.u32 4294901760, %v810_v35  ;;  %v815_v47 = vsub.f32 %v5038_v28, %v6940_v38  ;;  %v5122_v50 = vsub.f32 %v711_v36, %v711_v36  ;;  %v6936_v14 = vand.u32 4294901760, %v5109_v46 }
  0xa0   :  { %v5036_v27 = vpop.permute.xlu1 %560  ;;  %4274 = vmatprep.subr.msk.mxu0 %vm5018_vm10, %v6943_v63  ;;  %807 = vmatprep.subr.mxu1 %v806_v40  ;;  %v821_v48 = vand.u32 4294901760, %v820_v39  ;;  %v825_v54 = vsub.f32 %v5100_v43, %v6937_v49  ;;  %v712_v24 = vsel %vm4963_vm11, 1.0, %v6951_v0  ;;  %v703_v32 = vsel %vm5031_vm14, 1.0, %v6951_v0 }
  0xa1   :  { %7190 = vst [vmem:[#allocation28_spill] sm:$0xff] %v5036_v27  ;;  %4275 = vmatpush1.msk.msra.mxu0 %vm5031_vm14, %v6943_v63  ;;  %vm5083_vm9 = vcmp.eq.s32.totalorder %v5036_v27, %v4866_v57  ;;  %vm5096_vm8 = vcmp.eq.s32.totalorder %v5036_v27, %v4868_v58  ;;  %812 = vmatpush1.msra.mxu1 %v811_v42  ;;  %v816_v52 = vand.u32 4294901760, %v815_v47  ;;  %v7215_v35 = vmov 0 }
  0xa2   :  { %4276 = vmatprep.subr.msk.mxu0 %vm5046_vm1, %v6943_v63  ;;  %v7198_v37 = vsel %vm5083_vm9, 4294967295, %v7197_v37  ;;  %v7201_v41 = vsel %vm5096_vm8, 4294967295, %v7200_v41  ;;  %v826_v34 = vand.u32 4294901760, %v825_v54  ;;  %v5173_v36 = vsub.f32 %v712_v24, %v712_v24 }
  0xa3   :  { %7199 = vst [vmem:[#allocation31_spill] sm:$0xff] %v7198_v37  ;;  %4277 = vmatpush1.msk.msra.mxu0 %vm5065_vm4, %v6943_v63  ;;  %7202 = vst [vmem:[#allocation32_spill] sm:$0xff] %v7201_v41  ;;  %817 = vmatprep.subr.mxu1 %v816_v52  ;;  %v5178_v39 = vsub.f32 %v707_v51, %v707_v51  ;;  %v830_v40 = vsub.f32 %v5109_v46, %v6936_v14  ;;  %v6935_v42 = vand.u32 4294901760, %v5122_v50  ;;  %v7218_v51 = vmov 0 }
  0xa4   :  { %v5102_v44 = vpop.permute.xlu1 %554  ;;  %v5104_v45 = vpop.permute.xlu0 %557  ;;  %4278 = vmatprep.subr.msk.mxu0 %vm5083_vm9, %v6943_v63  ;;  %822 = vmatpush1.msra.mxu1 %v821_v48  ;;  %v708_v47 = vsel %vm4992_vm5, 1.0, %v6951_v0  ;;  %v6939_v48 = vand.u32 4294901760, %v5173_v36  ;;  %v699_v49 = vsel %vm5065_vm4, 1.0, %v6951_v0  ;;  %v696_v17 = vsel %vm5083_vm9, 1.0, %v7233_v9 }
  0xa5   :  { %7203 = vst [vmem:[#allocation33_spill] sm:$0xff] %v5102_v44  ;;  %7204 = vst [vmem:[#allocation34_spill] sm:$0xff] %v5104_v45  ;;  %4279 = vmatpush1.msk.msra.mxu0 %vm5096_vm8, %v6943_v63  ;;  %vm5129_vm3 = vcmp.eq.s32.totalorder %v5104_v45, %v4866_v57  ;;  %vm5138_vm2 = vcmp.eq.s32.totalorder %v5104_v45, %v4868_v58  ;;  %vm5151_vm12 = vcmp.eq.s32.totalorder %v5102_v44, %v4866_v57  ;;  %v7247_v2 = vmov 0 }
  0xa6   :  { %v7206_v53 = vsel %vm5129_vm3, 4294967295, %v7205_v53  ;;  %v7209_v5 = vsel %vm5138_vm2, 4294967295, %v7208_v5  ;;  %4280 = vmatprep.subr.msk.mxu0 %vm5129_vm3, %v6943_v63  ;;  %v7212_v8 = vsel %vm5151_vm12, 4294967295, %v7211_v8  ;;  %vm5169_vm15 = vcmp.eq.s32.totalorder %v5102_v44, %v4868_v58  ;;  %827 = vmatprep.subr.mxu1 %v826_v34 }
  0xa7   :  { %7207 = vst [vmem:[#allocation35_spill] sm:$0xff] %v7206_v53  ;;  %7210 = vst [vmem:[#allocation36_spill] sm:$0xff] %v7209_v5  ;;  %4281 = vmatpush1.msk.msra.mxu0 %vm5138_vm2, %v6943_v63  ;;  %v7216_v35 = vsel %vm5169_vm15, 4294967295, %v7215_v35  ;;  %v5191_v52 = vsub.f32 %v708_v47, %v708_v47  ;;  %v831_v54 = vand.u32 4294901760, %v830_v40  ;;  %v840_v24 = vsub.f32 %v5122_v50, %v6935_v42 }
  0xa8   :  { %7213 = vst [vmem:[#allocation37_spill] sm:$0xff] %v7212_v8  ;;  %v5159_v31 = vpop.permute.xlu1 %551  ;;  %7217 = vst [vmem:[#allocation39_spill] sm:$0xff] %v7216_v35  ;;  %4282 = vmatprep.subr.msk.mxu0 %vm5151_vm12, %v6943_v63  ;;  %v7221_v34 = vmov 0  ;;  %v5215_v47 = vsub.f32 %v703_v32, %v703_v32  ;;  %v835_v40 = vsub.f32 %v5173_v36, %v6939_v48  ;;  %v5221_v14 = vpop.permute.xlu0 %548  ;;  %v6947_v32 = vand.u32 4294901760, %v5178_v39 }
  0xa9   :  { %7214 = vst [vmem:[#allocation38_spill] sm:$0xff] %v5159_v31  ;;  %4283 = vmatpush1.msk.msra.mxu0 %vm5169_vm15, %v6943_v63  ;;  %vm5195_vm0 = vcmp.eq.s32.totalorder %v5159_v31, %v4866_v57  ;;  %vm5206_vm5 = vcmp.eq.s32.totalorder %v5159_v31, %v4868_v58  ;;  %v6950_v42 = vand.u32 4294901760, %v5191_v52  ;;  %7224 = vst [vmem:[#allocation42_spill] sm:$0xff] %v5221_v14  ;;  %832 = vmatpush1.msra.mxu1 %v831_v54  ;;  %v7225_v54 = vmov 0 }
  0xaa   :  { %v7219_v51 = vsel %vm5195_vm0, 4294967295, %v7218_v51  ;;  %v7222_v34 = vsel %vm5206_vm5, 4294967295, %v7221_v34  ;;  %4284 = vmatprep.subr.msk.mxu0 %vm5195_vm0, %v6943_v63  ;;  %v841_v29 = vand.u32 4294901760, %v840_v24  ;;  %v704_v48 = vsel %vm5018_vm10, 1.0, %v6951_v0 }
  0xab   :  { %7220 = vst [vmem:[#allocation40_spill] sm:$0xff] %v7219_v51  ;;  %7223 = vst [vmem:[#allocation41_spill] sm:$0xff] %v7222_v34  ;;  %4285 = vmatpush1.msk.msra.mxu0 %vm5206_vm5, %v6943_v63  ;;  %v836_v38 = vand.u32 4294901760, %v835_v40  ;;  %v845_v23 = vsub.f32 %v5191_v52, %v6950_v42  ;;  %v5236_v26 = vsub.f32 %v704_v48, %v704_v48  ;;  %v7229_v42 = vmov 0 }
  0xac   :  { %v850_v63 = vsub.f32 %v5178_v39, %v6947_v32  ;;  %vm5243_vm11 = vcmp.eq.s32.totalorder %v5221_v14, %v4866_v57  ;;  %v5251_v24 = vpop.permute.xlu1 %545  ;;  %v5253_v48 = vsub.f32 %v699_v49, %v699_v49  ;;  %vm5258_vm10 = vcmp.eq.s32.totalorder %v5221_v14, %v4868_v58 }
  0xad   :  { %v7226_v54 = vsel %vm5243_vm11, 4294967295, %v7225_v54  ;;  %7228 = vst [vmem:[#allocation44_spill] sm:$0xff] %v5251_v24  ;;  %837 = vmatprep.subr.mxu1 %v836_v38  ;;  %v846_v40 = vand.u32 4294901760, %v845_v23  ;;  %v6960_v32 = vand.u32 4294901760, %v5236_v26  ;;  %v7230_v42 = vsel %vm5258_vm10, 4294967295, %v7229_v42 }
  0xae   :  { %7227 = vst [vmem:[#allocation43_spill] sm:$0xff] %v7226_v54  ;;  %7231 = vst [vmem:[#allocation45_spill] sm:$0xff] %v7230_v42  ;;  %v7232_v0 = vmov 1.0   ;;  %v695_v31 = vsel %vm5096_vm8, 1.0, %v7233_v9  ;;  %842 = vmatpush1.msra.mxu1 %v841_v29  ;;  %v851_v49 = vand.u32 4294901760, %v850_v63  ;;  %v6967_v23 = vand.u32 4294901760, %v5215_v47 }
  0xaf   :  { %4286 = vmatprep.subr.msk.mxu0 %vm5243_vm11, %v7232_v0  ;;  %847 = vmatprep.subr.mxu1 %v846_v40  ;;  %v855_v38 = vsub.f32 %v5236_v26, %v6960_v32  ;;  %v700_v14 = vsel %vm5046_vm1, 1.0, %v7233_v9  ;;  %vm5280_vm4 = vcmp.eq.s32.totalorder %v5251_v24, %v4866_v57  ;;  %v7234_v29 = vmov 0  ;;  %v5293_v32 = vpop.permute.xlu0 %542 }
  0xb0   :  { %4287 = vmatpush1.msk.msra.mxu0 %vm5258_vm10, %v7232_v0  ;;  %v7235_v29 = vsel %vm5280_vm4, 4294967295, %v7234_v29  ;;  %852 = vmatpush1.msra.mxu1 %v851_v49  ;;  %v860_v63 = vsub.f32 %v5215_v47, %v6967_v23  ;;  %v5287_v40 = vsub.f32 %v700_v14, %v700_v14  ;;  %7237 = vst [vmem:[#allocation47_spill] sm:$0xff] %v5293_v32  ;;  %v7239_v49 = vmov 0 }
  0xb1   :  { %7236 = vst [vmem:[#allocation46_spill] sm:$0xff] %v7235_v29  ;;  %v5295_v45 = vsub.f32 %v695_v31, %v695_v31  ;;  %v856_v44 = vand.u32 4294901760, %v855_v38  ;;  %vm5299_vm1 = vcmp.eq.s32.totalorder %v5251_v24, %v4868_v58  ;;  %v6978_v14 = vand.u32 4294901760, %v5253_v48  ;;  %4288 = vmatprep.subr.msk.mxu0 %vm5280_vm4, %v7232_v0 }
  0xb2   :  { %v7240_v49 = vsel %vm5299_vm1, 4294967295, %v7239_v49  ;;  %v691_v23 = vsel %vm5138_vm2, 1.0, %v7233_v9  ;;  %v861_v27 = vand.u32 4294901760, %v860_v63  ;;  %v6985_v31 = vand.u32 4294901760, %v5287_v40  ;;  %4289 = vmatpush1.msk.msra.mxu0 %vm5299_vm1, %v7232_v0 }
  0xb3   :  { %7238 = vst [vmem:[#allocation48_spill] sm:$0xff] %v5295_v45  ;;  %7241 = vst [vmem:[#allocation49_spill] sm:$0xff] %v7240_v49  ;;  %v687_v38 = vsel %vm5169_vm15, 1.0, %v7233_v9  ;;  %857 = vmatprep.subr.mxu1 %v856_v44  ;;  %v870_v24 = vsub.f32 %v5253_v48, %v6978_v14  ;;  %vm5325_vm8 = vcmp.eq.s32.totalorder %v5293_v32, %v4866_v57  ;;  %v7242_v63 = vmov 0  ;;  %v5384_v55 = vpop.permute.xlu0 %536 }
  0xb4   :  { %v7243_v63 = vsel %vm5325_vm8, 4294967295, %v7242_v63  ;;  %862 = vmatpush1.msra.mxu1 %v861_v27  ;;  %v865_v10 = vsub.f32 %v5287_v40, %v6985_v31  ;;  %v5332_v44 = vsub.f32 %v696_v17, %v696_v17  ;;  %v5338_v14 = vsub.f32 %v691_v23, %v691_v23  ;;  %v5347_v31 = vpop.permute.xlu1 %539  ;;  %4290 = vmatprep.subr.msk.mxu0 %vm5325_vm8, %v7232_v0 }
  0xb5   :  { %7244 = vst [vmem:[#allocation50_spill] sm:$0xff] %v7243_v63  ;;  %v871_v6 = vand.u32 4294901760, %v870_v24  ;;  %vm5342_vm2 = vcmp.eq.s32.totalorder %v5293_v32, %v4868_v58  ;;  %v6994_v27 = vand.u32 4294901760, %v5295_v45  ;;  %7250 = vst [vmem:[#allocation54_spill] sm:$0xff] %v5347_v31  ;;  %v683_v17 = vsel %vm5206_vm5, 1.0, %v7233_v9 }
  0xb6   :  { %7245 = vst [vmem:[#allocation51_spill] sm:$0xff] %v5332_v44  ;;  %7246 = vst [vmem:[#allocation52_spill] sm:$0xff] %v5338_v14  ;;  %v7248_v2 = vsel %vm5342_vm2, 4294967295, %v7247_v2  ;;  %v866_v23 = vand.u32 4294901760, %v865_v10  ;;  %v6997_v24 = vand.u32 4294901760, %v5332_v44  ;;  %4291 = vmatpush1.msk.msra.mxu0 %vm5342_vm2, %v7232_v0  ;;  %v5359_v32 = vsub.f32 %v687_v38, %v687_v38 }
  0xb7   :  { %7249 = vst [vmem:[#allocation53_spill] sm:$0xff] %v7248_v2  ;;  %v880_v1 = vsub.f32 %v5295_v45, %v6994_v27  ;;  %v692_v56 = vsel %vm5129_vm3, 1.0, %v7233_v9  ;;  %vm5374_vm15 = vcmp.eq.s32.totalorder %v5347_v31, %v4868_v58  ;;  %v7253_v38 = vmov 0  ;;  %7259 = vst [vmem:[#allocation59_spill] sm:$0xff] %v5384_v55 }
  0xb8   :  { %7251 = vst [vmem:[#allocation55_spill] sm:$0xff] %v5359_v32  ;;  %867 = vmatprep.subr.mxu1 %v866_v23  ;;  %v875_v10 = vsub.f32 %v5332_v44, %v6997_v24  ;;  %v5370_v60 = vsub.f32 %v692_v56, %v692_v56  ;;  %v7254_v38 = vsel %vm5374_vm15, 4294967295, %v7253_v38  ;;  %vm5380_vm14 = vcmp.eq.s32.totalorder %v5347_v31, %v4866_v57 }
  0xb9   :  { %7255 = vst [vmem:[#allocation57_spill] sm:$0xff] %v7254_v38  ;;  %v7256_v27 = vmov 0  ;;  %v5386_v23 = vsub.f32 %v683_v17, %v683_v17  ;;  %v679_v56 = vsel %vm5258_vm10, 1.0, %v7233_v9  ;;  %872 = vmatpush1.msra.mxu1 %v871_v6  ;;  %v881_v24 = vand.u32 4294901760, %v880_v1  ;;  %4292 = vmatprep.subr.msk.mxu0 %vm5380_vm14, %v7232_v0 }
  0xba   :  { %7252 = vst [vmem:[#allocation56_spill] sm:$0xff] %v5370_v60  ;;  %v7257_v27 = vsel %vm5380_vm14, 4294967295, %v7256_v27  ;;  %v7018_v59 = vand.u32 4294901760, %v5338_v14  ;;  %v675_v31 = vsel %vm5299_vm1, 1.0, %v7233_v9  ;;  %v876_v45 = vand.u32 4294901760, %v875_v10  ;;  %4293 = vmatpush1.msk.msra.mxu0 %vm5374_vm15, %v7232_v0 }
  0xbb   :  { %7258 = vst [vmem:[#allocation58_spill] sm:$0xff] %v7257_v27  ;;  %7260 = vst [vmem:[#allocation60_spill] sm:$0xff] %v5386_v23  ;;  %v671_v17 = vsel %vm5342_vm2, 1.0, %v7233_v9  ;;  %v667_v1 = vsel %vm5374_vm15, 1.0, %v7233_v9  ;;  %v688_v10 = vsel %vm5151_vm12, 1.0, %v7233_v9  ;;  %vm5416_vm2 = vcmp.eq.s32.totalorder %v5384_v55, %v4868_v58 }
  0xbc   :  { %v890_v6 = vsub.f32 %v5338_v14, %v7018_v59  ;;  %v7261_v42 = vmov 0  ;;  %v5420_v2 = vsub.f32 %v679_v56, %v679_v56  ;;  %877 = vmatprep.subr.mxu1 %v876_v45  ;;  %v7265_v38 = vand.u32 4294901760, %v5370_v60 }
  0xbd   :  { %v7262_v42 = vsel %vm5416_vm2, 4294967295, %v7261_v42  ;;  %v5425_v44 = vsub.f32 %v688_v10, %v688_v10  ;;  %vm5429_vm15 = vcmp.eq.s32.totalorder %v5384_v55, %v4866_v57  ;;  %v7267_v59 = vmov 0  ;;  %882 = vmatpush1.msra.mxu1 %v881_v24 }
  0xbe   :  { %7263 = vst [vmem:[#allocation61_spill] sm:$0xff] %v7262_v42  ;;  %7264 = vst [vmem:[#allocation62_spill] sm:$0xff] %v5420_v2  ;;  %v885_v49 = vsub.f32 %v5370_v60, %v7265_v38  ;;  %v7268_v59 = vsel %vm5429_vm15, 4294967295, %v7267_v59  ;;  %v5433_v14 = vsub.f32 %v675_v31, %v675_v31  ;;  %v5435_v58 = vsub.f32 %v671_v17, %v671_v17 }
  0xbf   :  { %7266 = vst [vmem:[#allocation63_spill] sm:$0xff] %v5425_v44  ;;  %7269 = vst [vmem:[#allocation64_spill] sm:$0xff] %v7268_v59  ;;  %v891_v56 = vand.u32 4294901760, %v890_v6  ;;  %v7023_v45 = vand.u32 4294901760, %v5359_v32  ;;  %4294 = vmatprep.subr.msk.mxu0 %vm5429_vm15, %v7232_v0  ;;  %v5441_v10 = vsub.f32 %v667_v1, %v667_v1  ;;  %v7033_v57 = vand.u32 4294901760, %v5425_v44 }
  0xc0   :  { %7270 = vst [vmem:[#allocation65_spill] sm:$0xff] %v5433_v14  ;;  %7271 = vst [vmem:[#allocation66_spill] sm:$0xff] %v5435_v58  ;;  %v886_v38 = vand.u32 4294901760, %v885_v49  ;;  %v663_v31 = vsel %vm5416_vm2, 1.0, %v7233_v9  ;;  %4295 = vmatpush1.msk.msra.mxu0 %vm5416_vm2, %v7232_v0  ;;  %v684_v49 = vsel %vm5195_vm0, 1.0, %v7233_v9  ;;  %v7036_v17 = vand.u32 4294901760, %v5386_v23 }
  0xc1   :  { %7272 = vst [vmem:[#allocation67_spill] sm:$0xff] %v5441_v10  ;;  %v900_v24 = vsub.f32 %v5359_v32, %v7023_v45  ;;  %v680_v1 = vsel %vm5243_vm11, 1.0, %v7233_v9  ;;  %1004 = vmatprep.subr.mxu0 %v5009_v20  ;;  %v895_v6 = vsub.f32 %v5425_v44, %v7033_v57  ;;  %v5464_v55 = vsub.f32 %v684_v49, %v684_v49 }
  0xc2   :  { %887 = vmatprep.subr.mxu1 %v886_v38  ;;  %v5466_v45 = vsub.f32 %v680_v1, %v680_v1  ;;  %v7037_v42 = vand.u32 4294901760, %v5420_v2  ;;  %v910_v60 = vsub.f32 %v5386_v23, %v7036_v17  ;;  %v676_v38 = vsel %vm5280_vm4, 1.0, %v7233_v9 }
  0xc3   :  { %7273 = vst [vmem:[#allocation68_spill] sm:$0xff] %v5464_v55  ;;  %892 = vmatpush1.msra.mxu1 %v891_v56  ;;  %v901_v32 = vand.u32 4294901760, %v900_v24  ;;  %v896_v54 = vand.u32 4294901760, %v895_v6  ;;  %v7040_v49 = vand.u32 4294901760, %v5464_v55  ;;  %v5481_v24 = vsub.f32 %v663_v31, %v663_v31 }
  0xc4   :  { %7274 = vst [vmem:[#allocation69_spill] sm:$0xff] %v5466_v45  ;;  %v7045_v1 = vand.u32 4294901760, %v5466_v45  ;;  %v920_v56 = vsub.f32 %v5420_v2, %v7037_v42  ;;  %v911_v57 = vand.u32 4294901760, %v910_v60  ;;  %v5483_v44 = vsub.f32 %v676_v38, %v676_v38 }
  0xc5   :  { %v672_v17 = vsel %vm5325_vm8, 1.0, %v7233_v9  ;;  %897 = vmatprep.subr.mxu1 %v896_v54  ;;  %v905_v6 = vsub.f32 %v5464_v55, %v7040_v49  ;;  %v7276_v42 = vand.u32 4294901760, %v5433_v14  ;;  %v7051_v54 = vand.u32 4294901760, %v5435_v58 }
  0xc6   :  { %7275 = vst [vmem:[#allocation70_spill] sm:$0xff] %v5483_v44  ;;  %v915_v20 = vsub.f32 %v5466_v45, %v7045_v1  ;;  %v5497_v60 = vsub.f32 %v672_v17, %v672_v17  ;;  %902 = vmatpush1.msra.mxu1 %v901_v32  ;;  %v921_v38 = vand.u32 4294901760, %v920_v56  ;;  %v7048_v2 = vand.u32 4294901760, %v5483_v44 }
  0xc7   :  { %v930_v31 = vsub.f32 %v5433_v14, %v7276_v42  ;;  %v668_v49 = vsel %vm5380_vm14, 1.0, %v7233_v9  ;;  %v906_v23 = vand.u32 4294901760, %v905_v6  ;;  %v940_v32 = vsub.f32 %v5435_v58, %v7051_v54 }
  0xc8   :  { %7277 = vst [vmem:[#allocation71_spill] sm:$0xff] %v5497_v60  ;;  %v916_v55 = vand.u32 4294901760, %v915_v20  ;;  %v7060_v1 = vand.u32 4294901760, %v5497_v60  ;;  %v5505_v45 = vsub.f32 %v668_v49, %v668_v49  ;;  %v925_v42 = vsub.f32 %v5483_v44, %v7048_v2 }
  0xc9   :  { %v7063_v17 = vand.u32 4294901760, %v5441_v10  ;;  %v664_v56 = vsel %vm5429_vm15, 1.0, %v7233_v9  ;;  %907 = vmatprep.subr.mxu1 %v906_v23  ;;  %v931_v58 = vand.u32 4294901760, %v930_v31  ;;  %v7279_v31 = vand.u32 4294901760, %v5481_v24 }
  0xca   :  { %7278 = vst [vmem:[#allocation72_spill] sm:$0xff] %v5505_v45  ;;  %v935_v20 = vsub.f32 %v5497_v60, %v7060_v1  ;;  %v7064_v49 = vand.u32 4294901760, %v5505_v45  ;;  %v5521_v6 = vsub.f32 %v664_v56, %v664_v56  ;;  %912 = vmatpush1.msra.mxu1 %v911_v57  ;;  %v926_v54 = vand.u32 4294901760, %v925_v42 }
  0xcb   :  { %v950_v44 = vsub.f32 %v5441_v10, %v7063_v17  ;;  %917 = vmatprep.subr.mxu1 %v916_v55  ;;  %v941_v57 = vand.u32 4294901760, %v940_v32  ;;  %v960_v42 = vsub.f32 %v5481_v24, %v7279_v31  ;;  %vm7284_vm2 = vnez %v7164_v7 }
  0xcc   :  { %v936_v27 = vand.u32 4294901760, %v935_v20  ;;  %v945_v56 = vsub.f32 %v5505_v45, %v7064_v49  ;;  %v7081_v1 = vand.u32 4294901760, %v5521_v6  ;;  %922 = vmatpush1.msra.mxu1 %v921_v38 }
  0xcd   :  { %927 = vmatprep.subr.mxu1 %v926_v54  ;;  %v951_v20 = vand.u32 4294901760, %v950_v44  ;;  %v961_v32 = vand.u32 4294901760, %v960_v42 }
  0xce   :  { %v107_v14 = vpop.f32.mrf.mxu0  ;;  %v183_v59 = vpop.f32.mrf.mxu1  ;;  %v955_v55 = vsub.f32 %v5521_v6, %v7081_v1  ;;  %932 = vmatpush1.msra.mxu1 %v931_v58  ;;  %v7319_v1 = vld [vmem:[#allocation70_spill] sm:$0xff] }
  0xcf   :  { %v108_v23 = vadd.f32 %v107_v14, %v5011_v21  ;;  %v946_v21 = vand.u32 4294901760, %v945_v56  ;;  %937 = vmatprep.subr.mxu1 %v936_v27 }
  0xd0   :  { %v4571_v2 = vpop.f32.mrf.mxu0  ;;  %v4576_v17 = vpop.f32.mrf.mxu1  ;;  %942 = vmatpush1.msra.mxu1 %v941_v57  ;;  %v7298_v57 = vld [vmem:[#allocation51_spill] sm:$0xff] }
  0xd1   :  { %v184_v60 = vadd.f32 %v183_v59, %v108_v23  ;;  %v956_v2 = vand.u32 4294901760, %v955_v55  ;;  %947 = vmatprep.subr.mxu1 %v946_v21  ;;  %v7300_v21 = vld [vmem:[#allocation48_spill] sm:$0xff]  ;;  %v7301_v55 = vld [vmem:[#allocation45_spill] sm:$0xff] }
  0xd2   :  { %v257_v14 = vpop.f32.mrf.mxu0  ;;  %v331_v10 = vpop.f32.mrf.mxu1  ;;  %952 = vmatpush1.msra.mxu1 %v951_v20  ;;  %v7303_v20 = vld [vmem:[#allocation52_spill] sm:$0xff]  ;;  %v7379_v34 = vand.u32 4294901760, %v7300_v21 }
  0xd3   :  { %v258_v49 = vadd.f32 %v257_v14, %v184_v60  ;;  %957 = vmatprep.subr.mxu1 %v956_v2  ;;  %v7302_v14 = vld [vmem:[#allocation56_spill] sm:$0xff]  ;;  %v7304_v2 = vld [vmem:[#allocation49_spill] sm:$0xff] }
  0xd4   :  { %v4581_v38 = vpop.f32.mrf.mxu0  ;;  %v4586_v31 = vpop.f32.mrf.mxu1  ;;  %962 = vmatpush1.msra.mxu1 %v961_v32  ;;  %v7306_v32 = vld [vmem:[#allocation55_spill] sm:$0xff] }
  0xd5   :  { %v332_v45 = vadd.f32 %v331_v10, %v258_v49  ;;  %4296 = vmatprep.subr.msk.mxu1 %vm4880_vm6, %v7232_v0  ;;  %vm7283_vm6 = vnez %v7157_v3  ;;  %v7305_v38 = vld [vmem:[#allocation63_spill] sm:$0xff]  ;;  %v7307_v31 = vld [vmem:[#allocation53_spill] sm:$0xff] }
  0xd6   :  { %v405_v59 = vpop.f32.mrf.mxu0  ;;  %v477_v17 = vpop.f32.mrf.mxu1 }
  0xd7   :  { %v406_v54 = vadd.f32 %v405_v59, %v332_v45  ;;  %v7309_v59 = vld [vmem:[#allocation68_spill] sm:$0xff] }
  0xd8   :  { %v4591_v23 = vpop.f32.mrf.mxu0  ;;  %v4596_v58 = vpop.f32.mrf.mxu1 }
  0xd9   :  { %v478_v56 = vadd.f32 %v477_v17, %v406_v54  ;;  %v7310_v54 = vld [vmem:[#allocation58_spill] sm:$0xff]  ;;  %v7311_v17 = vld [vmem:[#allocation60_spill] sm:$0xff]  ;;  %v7312_v23 = vld [vmem:[#allocation57_spill] sm:$0xff] }
  0xda   :  { %v7315_v58 = vld [vmem:[#allocation64_spill] sm:$0xff] }
  0xdb   :  { %481 = vst [vmem:[#allocation2] sm:$0xf] %v478_v56  ;;  %v7314_v56 = vld [vmem:[#allocation69_spill] sm:$0xff] }
  0xe2   :  { %v517_v44 = vld [vmem:[#allocation2] sm:$0xf] }
  0xe3   :  { %v5541_v27 = vand.u32 4294901760, %v517_v44 }
  0xe5   :  { %7280 = vst [vmem:[#allocation73_spill] sm:$0xff] %v5541_v27  ;;  %997 = vmatmul.mubr.f32.vlgmr.msra.gmra.mxu1 %v5541_v27  ;;  %v5545_v10 = vsub.f32 %v517_v44, %v5541_v27  ;;  %v7316_v44 = vld [vmem:[#allocation62_spill] sm:$0xff]  ;;  %v7323_v27 = vld [vmem:[#allocation71_spill] sm:$0xff] }
  0xe6   :  { %4297 = vmatpush1.msk.msra.mxu1 %vm4886_vm7, %v7232_v0  ;;  %1172 = vmatprep.mubr.f32.mxu1 %v7233_v9  ;;  %vm7285_vm7 = vnez %v7168_v11 }
  0xe7   :  { %7281 = vst [vmem:[#allocation74_spill] sm:$0xff] %v5545_v10  ;;  %4298 = vmatprep.subr.msk.mxu1 %vm4916_vm13, %v7232_v0  ;;  %v5555_v45 = vand.u32 4294901760, %v5545_v10  ;;  %vm7286_vm13 = vnez %v7171_v13 }
  0xe8   :  { %4299 = vmatpush1.msk.msra.mxu1 %vm7283_vm6, %v7232_v0  ;;  %vm7288_vm6 = vnez %v7174_v15 }
  0xe9   :  { %7282 = vst [vmem:[#allocation75_spill] sm:$0xff] %v5555_v45  ;;  %4300 = vmatprep.subr.msk.mxu1 %vm7284_vm2, %v7232_v0  ;;  %v795_v60 = vsub.f32 %v5545_v10, %v5555_v45  ;;  %vm7289_vm2 = vnez %v7178_v18 }
  0xea   :  { %4301 = vmatpush1.msk.msra.mxu1 %vm7285_vm7, %v7232_v0  ;;  %vm7290_vm7 = vnez %v7181_v19 }
  0xeb   :  { %4302 = vmatprep.subr.msk.mxu1 %vm7286_vm13, %v7232_v0  ;;  %v5571_v49 = vand.u32 4294901760, %v795_v60  ;;  %vm7291_vm13 = vnez %v7185_v22  ;;  %v7317_v60 = vld [vmem:[#allocation61_spill] sm:$0xff]  ;;  %v7377_v22 = vld [vmem:[#allocation34_spill] sm:$0xff] }
  0xec   :  { %4303 = vmatpush1.msk.msra.mxu1 %vm7288_vm6, %v7232_v0  ;;  %vm7292_vm6 = vnez %v7188_v25 }
  0xed   :  { %7287 = vst [vmem:[#allocation76_spill] sm:$0xff] %v5571_v49  ;;  %4304 = vmatprep.subr.msk.mxu1 %vm7289_vm2, %v7232_v0  ;;  %797 = vmatmul.mubr.f32.vlgmr.msra.gmra.mxu0 %v5571_v49  ;;  %vm7293_vm2 = vnez %v7192_v30  ;;  %v7321_v49 = vld [vmem:[#allocation65_spill] sm:$0xff]  ;;  %v7368_v30 = vand.u32 4294901760, %v5253_v48 }
  0xee   :  { %1006 = vmatpush1.msra.mxu0 %v4959_v12  ;;  %4305 = vmatpush1.msk.msra.mxu1 %vm7290_vm7, %v7232_v0  ;;  %vm7294_vm7 = vnez %v7195_v33 }
  0xef   :  { %1008 = vmatprep.subr.mxu0 %v5038_v28  ;;  %4306 = vmatprep.subr.msk.mxu1 %vm7291_vm13, %v7232_v0 }
  0xf0   :  { %1010 = vmatpush1.msra.mxu0 %v4981_v16  ;;  %4307 = vmatpush1.msk.msra.mxu1 %vm7292_vm6, %v7232_v0  ;;  %vm7295_vm6 = vnez %v7201_v41 }
  0xf1   :  { %1012 = vmatprep.subr.mxu0 %v5100_v43  ;;  %4308 = vmatprep.subr.msk.mxu1 %vm7293_vm2, %v7232_v0 }
  0xf2   :  { %1014 = vmatpush1.msra.mxu0 %v5109_v46  ;;  %4309 = vmatpush1.msk.msra.mxu1 %vm7294_vm7, %v7232_v0  ;;  %vm7296_vm7 = vnez %v7209_v5  ;;  %v7363_v5 = vld [vmem:[#allocation16_spill] sm:$0xff] }
  0xf3   :  { %1016 = vmatprep.subr.mxu0 %v5173_v36  ;;  %4310 = vmatprep.subr.msk.mxu1 %vm5083_vm9, %v7232_v0 }
  0xf4   :  { %1018 = vmatpush1.msra.mxu0 %v5122_v50  ;;  %4311 = vmatpush1.msk.msra.mxu1 %vm7295_vm6, %v7232_v0  ;;  %vm7297_vm6 = vnez %v7216_v35 }
  0xf5   :  { %1020 = vmatprep.subr.mxu0 %v5191_v52  ;;  %4312 = vmatprep.subr.msk.mxu1 %vm5129_vm3, %v7232_v0 }
  0xf6   :  { %1022 = vmatpush1.msra.mxu0 %v5178_v39  ;;  %4313 = vmatpush1.msk.msra.mxu1 %vm7296_vm7, %v7232_v0 }
  0xf7   :  { %1024 = vmatprep.subr.mxu0 %v5236_v26  ;;  %4314 = vmatprep.subr.msk.mxu1 %vm5151_vm12, %v7232_v0 }
  0xf8   :  { %1026 = vmatpush1.msra.mxu0 %v5215_v47  ;;  %4315 = vmatpush1.msk.msra.mxu1 %vm7297_vm6, %v7232_v0 }
  0xf9   :  { %1028 = vmatprep.subr.mxu0 %v5287_v40  ;;  %4316 = vmatprep.subr.msk.mxu1 %vm5195_vm0, %v7232_v0 }
  0xfa   :  { %1030 = vmatpush1.msra.mxu0 %v5253_v48  ;;  %4317 = vmatpush1.msk.msra.mxu1 %vm5206_vm5, %v7232_v0  ;;  %v7376_v48 = vand.u32 4294901760, %v7298_v57 }
  0xfb   :  { %1032 = vmatprep.subr.mxu0 %v7298_v57  ;;  %4318 = vmatprep.subr.msk.mxu1 %vm5243_vm11, %v7232_v0 }
  0xfc   :  { %1034 = vmatpush1.msra.mxu0 %v7300_v21  ;;  %4319 = vmatpush1.msk.msra.mxu1 %vm5258_vm10, %v7232_v0  ;;  %vm7308_vm10 = vnez %v7307_v31 }
  0xfd   :  { %1036 = vmatprep.subr.mxu0 %v7302_v14  ;;  %4320 = vmatprep.subr.msk.mxu1 %vm5280_vm4, %v7232_v0 }
  0xfe   :  { %1038 = vmatpush1.msra.mxu0 %v7303_v20  ;;  %4321 = vmatpush1.msk.msra.mxu1 %vm5299_vm1, %v7232_v0  ;;  %vm7313_vm1 = vnez %v7312_v23 }
  0xff   :  { %1040 = vmatprep.subr.mxu0 %v7305_v38  ;;  %4322 = vmatprep.subr.msk.mxu1 %vm5325_vm8, %v7232_v0 }
 0x100   :  { %1042 = vmatpush1.msra.mxu0 %v7306_v32  ;;  %4323 = vmatpush1.msk.msra.mxu1 %vm7308_vm10, %v7232_v0  ;;  %vm7318_vm10 = vnez %v7317_v60  ;;  %v7325_v60 = vld [vmem:[#allocation66_spill] sm:$0xff] }
 0x101   :  { %1044 = vmatprep.subr.mxu0 %v7309_v59  ;;  %4324 = vmatprep.subr.msk.mxu1 %vm5380_vm14, %v7232_v0  ;;  %vm7320_vm14 = vnez %v7149_v61  ;;  %v7327_v61 = vld [vmem:[#allocation72_spill] sm:$0xff] }
 0x102   :  { %1046 = vmatpush1.msra.mxu0 %v7311_v17  ;;  %4325 = vmatpush1.msk.msra.mxu1 %vm7313_vm1, %v7232_v0  ;;  %vm7322_vm1 = vnez %v7152_v62  ;;  %v7329_v62 = vld [vmem:[#allocation67_spill] sm:$0xff] }
 0x103   :  { %1048 = vmatprep.subr.mxu0 %v7314_v56  ;;  %4326 = vmatprep.subr.msk.mxu1 %vm5429_vm15, %v7232_v0  ;;  %vm7324_vm15 = vnez %v7160_v4 }
 0x104   :  { %1050 = vmatpush1.msra.mxu0 %v7316_v44  ;;  %4327 = vmatpush1.msk.msra.mxu1 %vm7318_vm10, %v7232_v0  ;;  %vm7326_vm10 = vnez %v7157_v3 }
 0x105   :  { %1052 = vmatprep.subr.mxu0 %v7319_v1  ;;  %1176 = vmatmul.mubr.f32.vlgmr.msra.gmra.mxu1 %v5555_v45 }
 0x106   :  { %4328 = vmatprep.subr.msk.mxu1 %vm7320_vm14, %v7232_v0  ;;  %1054 = vmatpush1.msra.mxu0 %v7321_v49  ;;  %vm7328_vm14 = vnez %v7164_v7  ;;  %v7333_v7 = vld [vmem:[#allocation25_spill] sm:$0xff] }
 0x107   :  { %4329 = vmatpush1.msk.msra.mxu1 %vm7322_vm1, %v7232_v0  ;;  %1056 = vmatprep.subr.mxu0 %v7323_v27  ;;  %vm7330_vm1 = vnez %v7168_v11  ;;  %v7334_v3 = vand.u32 4294901760, %v7333_v7  ;;  %v7338_v11 = vand.u32 4294901760, %v5038_v28  ;;  %v7341_v7 = vand.u32 4294901760, %v5100_v43  ;;  %v7348_v28 = vld [vmem:[#allocation8_spill] sm:$0xff]  ;;  %v7349_v43 = vld [vmem:[#allocation6_spill] sm:$0xff] }
 0x108   :  { %4330 = vmatprep.subr.msk.mxu1 %vm7324_vm15, %v7232_v0  ;;  %1058 = vmatpush1.msra.mxu0 %v7325_v60  ;;  %vm7331_vm15 = vnez %v7171_v13  ;;  %v7336_v13 = vand.u32 4294901760, %v4959_v12  ;;  %v7344_v12 = vand.u32 4294901760, %v5173_v36  ;;  %v7351_v36 = vand.u32 4294901760, %v5178_v39 }
 0x109   :  { %4331 = vmatpush1.msk.msra.mxu1 %vm7326_vm10, %v7232_v0  ;;  %1060 = vmatprep.subr.mxu0 %v7327_v61  ;;  %vm7332_vm10 = vnez %v7174_v15 }
 0x10a   :  { %4332 = vmatprep.subr.msk.mxu1 %vm7328_vm14, %v7232_v0  ;;  %1062 = vmatpush1.msra.mxu0 %v7329_v62 }
 0x10b   :  { %4333 = vmatpush1.msk.msra.mxu1 %vm7330_vm1, %v7232_v0  ;;  %1064 = vmatprep.subr.mxu0 %v5521_v6  ;;  %vm7335_vm1 = vnez %v7178_v18 }
 0x10c   :  { %4334 = vmatprep.subr.msk.mxu1 %vm7331_vm15, %v7232_v0  ;;  %1066 = vmatpush1.msra.mxu0 %v5481_v24  ;;  %vm7337_vm15 = vnez %v7181_v19 }
 0x10d   :  { %1099 = vmatprep.mubr.f32.mxu0 %v7233_v9  ;;  %4335 = vmatpush1.msk.msra.mxu1 %vm7332_vm10, %v7232_v0 }
 0x10e   :  { %1102 = vmatmul.mubr.f32.vlgmr.msra.gmra.mxu0 %v5545_v10  ;;  %1184 = vmatprep.subr.mxu0 %v7334_v3  ;;  %v7339_v3 = vand.u32 4294901760, %v4981_v16  ;;  %v7347_v16 = vand.u32 4294901760, %v5191_v52 }
 0x10f   :  { %4336 = vmatprep.subr.msk.mxu1 %vm7335_vm1, %v7232_v0  ;;  %1187 = vmatpush1.msra.mxu0 %v7336_v13  ;;  %vm7340_vm1 = vnez %v7188_v25  ;;  %v7345_v13 = vand.u32 4294901760, %v5122_v50  ;;  %v7352_v50 = vld [vmem:[#allocation9_spill] sm:$0xff] }
 0x110   :  { %4337 = vmatpush1.msk.msra.mxu1 %vm7337_vm15, %v7232_v0  ;;  %1190 = vmatprep.subr.mxu0 %v7338_v11  ;;  %v7342_v11 = vand.u32 4294901760, %v5109_v46 }
 0x111   :  { %4338 = vmatprep.subr.msk.mxu1 %vm7291_vm13, %v7232_v0  ;;  %1193 = vmatpush1.msra.mxu0 %v7339_v3  ;;  %vm7343_vm13 = vnez %v7195_v33  ;;  %v7353_v3 = vld [vmem:[#allocation7_spill] sm:$0xff] }
 0x112   :  { %4339 = vmatpush1.msk.msra.mxu1 %vm7340_vm1, %v7232_v0  ;;  %1196 = vmatprep.subr.mxu0 %v7341_v7 }
 0x113   :  { %4340 = vmatprep.subr.msk.mxu1 %vm7293_vm2, %v7232_v0  ;;  %1199 = vmatpush1.msra.mxu0 %v7342_v11  ;;  %vm7346_vm2 = vnez %v7201_v41  ;;  %v7356_v11 = vld [vmem:[#allocation12_spill] sm:$0xff] }
 0x114   :  { %4341 = vmatpush1.msk.msra.mxu1 %vm7343_vm13, %v7232_v0  ;;  %1202 = vmatprep.subr.mxu0 %v7344_v12  ;;  %vm7350_vm13 = vcmp.eq.s32.totalorder %v7348_v28, %v7349_v43 }
 0x115   :  { %4342 = vmatprep.subr.msk.mxu1 %vm5083_vm9, %v7232_v0  ;;  %1205 = vmatpush1.msra.mxu0 %v7345_v13  ;;  %v717_v46 = vsel %vm7350_vm13, 1.0, %v7233_v9  ;;  %vm7354_vm9 = vcmp.eq.s32.totalorder %v7352_v50, %v7353_v3  ;;  %vm7357_vm13 = vcmp.eq.s32.totalorder %v7356_v11, %v7349_v43  ;;  %v7358_v13 = vld [vmem:[#allocation13_spill] sm:$0xff] }
 0x116   :  { %4343 = vmatpush1.msk.msra.mxu1 %vm7346_vm2, %v7232_v0  ;;  %1208 = vmatprep.subr.mxu0 %v7347_v16  ;;  %v726_v7 = vsel %vm7354_vm9, 1.0, %v7233_v9  ;;  %vm7355_vm2 = vcmp.eq.s32.totalorder %v7352_v50, %v7349_v43  ;;  %v713_v12 = vsel %vm7357_vm13, 1.0, %v7233_v9  ;;  %v7360_v16 = vand.u32 4294901760, %v5236_v26 }
 0x117   :  { %4344 = vmatprep.subr.msk.mxu1 %vm5129_vm3, %v7232_v0  ;;  %1211 = vmatpush1.msra.mxu0 %v7351_v36  ;;  %v725_v52 = vsel %vm7355_vm2, 1.0, %v7233_v9  ;;  %vm7359_vm3 = vcmp.eq.s32.totalorder %v7358_v13, %v7349_v43  ;;  %v7361_v36 = vand.u32 4294901760, %v5215_v47  ;;  %vm7362_vm2 = vcmp.eq.s32.totalorder %v7358_v13, %v7353_v3 }
 0x118   :  { %v721_v39 = vsel %vm7359_vm3, 1.0, %v7233_v9  ;;  %4345 = vmatpush1.msk.msra.mxu1 %vm7296_vm7, %v7232_v0  ;;  %1214 = vmatprep.subr.mxu0 %v7360_v16  ;;  %v722_v53 = vsel %vm7362_vm2, 1.0, %v7233_v9  ;;  %v5788_v41 = vsub.f32 %v717_v46, %v717_v46  ;;  %vm7364_vm9 = vcmp.eq.s32.totalorder %v7363_v5, %v7349_v43  ;;  %v7365_v16 = vld [vmem:[#allocation18_spill] sm:$0xff] }
 0x119   :  { %4346 = vmatprep.subr.msk.mxu1 %vm5151_vm12, %v7232_v0  ;;  %1217 = vmatpush1.msra.mxu0 %v7361_v36  ;;  %v705_v26 = vsel %vm7364_vm9, 1.0, %v7233_v9  ;;  %vm7366_vm3 = vcmp.eq.s32.totalorder %v7365_v16, %v7349_v43  ;;  %v7367_v47 = vand.u32 4294901760, %v5287_v40  ;;  %v5803_v36 = vsub.f32 %v726_v7, %v726_v7  ;;  %v7370_v7 = vld [vmem:[#allocation22_spill] sm:$0xff] }
 0x11a   :  { %v709_v8 = vsel %vm7366_vm3, 1.0, %v7233_v9  ;;  %4347 = vmatpush1.msk.msra.mxu1 %vm7297_vm6, %v7232_v0  ;;  %v5805_v46 = vsub.f32 %v725_v52, %v725_v52  ;;  %v5807_v37 = vsub.f32 %v713_v12, %v713_v12  ;;  %v5809_v33 = vsub.f32 %v721_v39, %v721_v39  ;;  %v7372_v12 = vld [vmem:[#allocation28_spill] sm:$0xff]  ;;  %1382 = vmatprep.mubr.f32.mxu1 %v7233_v9 }
 0x11b   :  { %1220 = vmatprep.subr.mxu0 %v7367_v47  ;;  %4348 = vmatprep.subr.msk.mxu1 %vm5195_vm0, %v7232_v0  ;;  %vm7369_vm13 = vcmp.eq.s32.totalorder %v7348_v28, %v7353_v3  ;;  %vm7371_vm2 = vcmp.eq.s32.totalorder %v7370_v7, %v7349_v43  ;;  %vm7373_vm9 = vcmp.eq.s32.totalorder %v7372_v12, %v7349_v43  ;;  %v7374_v47 = vld [vmem:[#allocation33_spill] sm:$0xff]  ;;  %v7117_v21 = vand.u32 4294901760, %v5803_v36 }
 0x11c   :  { %1223 = vmatpush1.msra.mxu0 %v7368_v30  ;;  %v718_v40 = vsel %vm7369_vm13, 1.0, %v7233_v9  ;;  %v701_v52 = vsel %vm7371_vm2, 1.0, %v7233_v9  ;;  %v697_v39 = vsel %vm7373_vm9, 1.0, %v7233_v9  ;;  %vm7375_vm3 = vcmp.eq.s32.totalorder %v7374_v47, %v7349_v43  ;;  %4349 = vmatpush1.msk.msra.mxu1 %vm5206_vm5, %v7232_v0 }
 0x11d   :  { %v689_v30 = vsel %vm7375_vm3, 1.0, %v7233_v9  ;;  %1226 = vmatprep.subr.mxu0 %v7376_v48  ;;  %v5837_v51 = vsub.f32 %v722_v53, %v722_v53  ;;  %v5839_v35 = vsub.f32 %v705_v26, %v705_v26  ;;  %v5841_v25 = vsub.f32 %v709_v8, %v709_v8  ;;  %4350 = vmatprep.subr.msk.mxu1 %vm5243_vm11, %v7232_v0  ;;  %v7381_v8 = vld [vmem:[#allocation38_spill] sm:$0xff] }
 0x11e   :  { %vm7378_vm13 = vcmp.eq.s32.totalorder %v7377_v22, %v7349_v43  ;;  %1229 = vmatpush1.msra.mxu0 %v7379_v34  ;;  %vm7380_vm2 = vcmp.eq.s32.totalorder %v7356_v11, %v7353_v3  ;;  %vm7382_vm9 = vcmp.eq.s32.totalorder %v7381_v8, %v7349_v43  ;;  %v7383_v26 = vld [vmem:[#allocation42_spill] sm:$0xff]  ;;  %v7386_v34 = vand.u32 4294901760, %v7302_v14  ;;  %1310 = vmatprep.mubr.f32.mxu0 %v7233_v9 }
 0x11f   :  { %v693_v19 = vsel %vm7378_vm13, 1.0, %v7233_v9  ;;  %v714_v53 = vsel %vm7380_vm2, 1.0, %v7233_v9  ;;  %v685_v57 = vsel %vm7382_vm9, 1.0, %v7233_v9  ;;  %vm7384_vm3 = vcmp.eq.s32.totalorder %v7383_v26, %v7349_v43 }
 0x120   :  { %v681_v48 = vsel %vm7384_vm3, 1.0, %v7233_v9  ;;  %vm7385_vm13 = vnez %v7301_v55  ;;  %1232 = vmatprep.subr.mxu0 %v7386_v34  ;;  %v5870_v42 = vsub.f32 %v718_v40, %v718_v40  ;;  %v5872_v18 = vsub.f32 %v701_v52, %v701_v52 }
 0x121   :  { %4351 = vmatpush1.msk.msra.mxu1 %vm7385_vm13, %v7232_v0  ;;  %v5874_v15 = vsub.f32 %v697_v39, %v697_v39  ;;  %v5876_v4 = vsub.f32 %v689_v30, %v689_v30  ;;  %v7389_v55 = vand.u32 4294901760, %v7303_v20  ;;  %v5884_v34 = vsub.f32 %v693_v19, %v693_v19  ;;  %v7393_v30 = vld [vmem:[#allocation44_spill] sm:$0xff] }
 0x122   :  { %7387 = vst [vmem:[#allocation51_spill] sm:$0xff] %v5870_v42  ;;  %4352 = vmatprep.subr.msk.mxu1 %vm5280_vm4, %v7232_v0  ;;  %vm7390_vm2 = vnez %v7304_v2  ;;  %v7391_v40 = vand.u32 4294901760, %v7305_v38  ;;  %v5892_v39 = vsub.f32 %v714_v53, %v714_v53  ;;  %vm7392_vm9 = vcmp.eq.s32.totalorder %v7365_v16, %v7353_v3  ;;  %v7401_v53 = vld [vmem:[#allocation54_spill] sm:$0xff] }
 0x123   :  { %7388 = vst [vmem:[#allocation48_spill] sm:$0xff] %v5876_v4  ;;  %1235 = vmatpush1.msra.mxu0 %v7389_v55  ;;  %4353 = vmatpush1.msk.msra.mxu1 %vm7390_vm2, %v7232_v0  ;;  %v710_v55 = vsel %vm7392_vm9, 1.0, %v7233_v9  ;;  %v5898_v20 = vsub.f32 %v685_v57, %v685_v57  ;;  %v5900_v19 = vsub.f32 %v681_v48, %v681_v48  ;;  %v7395_v38 = vand.u32 4294901760, %v7306_v32  ;;  %v7413_v32 = vld [vmem:[#allocation61_spill] sm:$0xff] }
 0x124   :  { %1238 = vmatprep.subr.mxu0 %v7391_v40  ;;  %vm7394_vm3 = vcmp.eq.s32.totalorder %v7393_v30, %v7349_v43  ;;  %4354 = vmatprep.subr.msk.mxu1 %vm5325_vm8, %v7232_v0  ;;  %v7396_v40 = vld [vmem:[#allocation47_spill] sm:$0xff]  ;;  %vm7398_vm2 = vnez %v7307_v31  ;;  %v7399_v48 = vand.u32 4294901760, %v7309_v59  ;;  %v1468_v52 = vsub.f32 %v5803_v36, %v7117_v21 }
 0x125   :  { %v677_v14 = vsel %vm7394_vm3, 1.0, %v7233_v9  ;;  %1241 = vmatpush1.msra.mxu0 %v7395_v38  ;;  %vm7397_vm9 = vcmp.eq.s32.totalorder %v7396_v40, %v7349_v43  ;;  %4355 = vmatpush1.msk.msra.mxu1 %vm7398_vm2, %v7232_v0  ;;  %vm7400_vm3 = vcmp.eq.s32.totalorder %v7363_v5, %v7353_v3  ;;  %vm7402_vm2 = vnez %v7310_v54 }
 0x126   :  { %v673_v57 = vsel %vm7397_vm9, 1.0, %v7233_v9  ;;  %1244 = vmatprep.subr.mxu0 %v7399_v48  ;;  %v706_v38 = vsel %vm7400_vm3, 1.0, %v7233_v9  ;;  %4356 = vmatprep.subr.msk.mxu1 %vm7402_vm2, %v7232_v0  ;;  %v7403_v59 = vand.u32 4294901760, %v7311_v17  ;;  %v7404_v48 = vand.u32 4294901760, %v5805_v46 }
 0x127   :  { %v5940_v31 = vsub.f32 %v710_v55, %v710_v55  ;;  %v5942_v63 = vsub.f32 %v677_v14, %v677_v14  ;;  %vm7405_vm3 = vnez %v7312_v23  ;;  %v7406_v54 = vand.u32 4294901760, %v7314_v56 }
 0x128   :  { %1247 = vmatpush1.msra.mxu0 %v7403_v59  ;;  %v1473_v21 = vsub.f32 %v5805_v46, %v7404_v48  ;;  %4357 = vmatpush1.msk.msra.mxu1 %vm7405_vm3, %v7232_v0  ;;  %v7407_v17 = vand.u32 4294901760, %v5837_v51  ;;  %vm7408_vm9 = vcmp.eq.s32.totalorder %v7370_v7, %v7353_v3  ;;  %v5957_v14 = vsub.f32 %v673_v57, %v673_v57 }
 0x129   :  { %1250 = vmatprep.subr.mxu0 %v7406_v54  ;;  %v702_v55 = vsel %vm7408_vm9, 1.0, %v7233_v9  ;;  %vm7409_vm2 = vnez %v7315_v58  ;;  %v7410_v56 = vand.u32 4294901760, %v7316_v44  ;;  %v7411_v54 = vand.u32 4294901760, %v5809_v33  ;;  %v7418_v58 = vld [vmem:[#allocation73_spill] sm:$0xff] }
 0x12a   :  { %v1478_v59 = vsub.f32 %v5837_v51, %v7407_v17  ;;  %4358 = vmatprep.subr.msk.mxu1 %vm7409_vm2, %v7232_v0  ;;  %v5968_v2 = vsub.f32 %v706_v38, %v706_v38  ;;  %vm7412_vm9 = vcmp.eq.s32.totalorder %v7401_v53, %v7349_v43  ;;  %vm7414_vm2 = vnez %v7413_v32 }
 0x12b   :  { %1253 = vmatpush1.msra.mxu0 %v7410_v56  ;;  %v1483_v48 = vsub.f32 %v5809_v33, %v7411_v54  ;;  %v5974_v57 = vsel %vm7412_vm9, 1.0, %v7233_v9  ;;  %4359 = vmatpush1.msk.msra.mxu1 %vm7414_vm2, %v7232_v0  ;;  %v1469_v44 = vand.u32 4294901760, %v1468_v52  ;;  %v7415_v56 = vand.u32 4294901760, %v5870_v42 }
 0x12c   :  { %vm7416_vm3 = vcmp.eq.s32.totalorder %v7372_v12, %v7353_v3  ;;  %v7417_v17 = vand.u32 4294901760, %v7319_v1  ;;  %1384 = vmatmul.mubr.f32.vlgmr.msra.gmra.mxu1 %v7418_v58  ;;  %v1474_v23 = vand.u32 4294901760, %v1473_v21  ;;  %v7419_v32 = vand.u32 4294901760, %v5788_v41 }
 0x12d   :  { %v1488_v54 = vsub.f32 %v5870_v42, %v7415_v56  ;;  %v698_v38 = vsel %vm7416_vm3, 1.0, %v7233_v9  ;;  %v7133_v52 = vand.u32 4294901760, %v5940_v31  ;;  %v5994_v10 = vsub.f32 %v702_v55, %v702_v55  ;;  %1470 = vmatprep.subr.mxu1 %v1469_v44  ;;  %1658 = vmatprep.mubr.f32.mxu1 %v7233_v9 }
 0x12e   :  { %1256 = vmatprep.subr.mxu0 %v7417_v17  ;;  %v1493_v29 = vsub.f32 %v5788_v41, %v7419_v32  ;;  %v7420_v56 = vand.u32 4294901760, %v7321_v49  ;;  %v1479_v45 = vand.u32 4294901760, %v1478_v59  ;;  %v7421_v42 = vand.u32 4294901760, %v5892_v39  ;;  %1475 = vmatpush1.msra.mxu1 %v1474_v23 }
 0x12f   :  { %vm7422_vm3 = vcmp.eq.s32.totalorder %v7377_v22, %v7353_v3  ;;  %v7423_v32 = vand.u32 4294901760, %v7323_v27  ;;  %v1484_v49 = vand.u32 4294901760, %v1483_v48  ;;  %v7424_v59 = vand.u32 4294901760, %v5807_v37 }
 0x130   :  { %1259 = vmatpush1.msra.mxu0 %v7420_v56  ;;  %v1498_v1 = vsub.f32 %v5892_v39, %v7421_v42  ;;  %v694_v21 = vsel %vm7422_vm3, 1.0, %v7233_v9  ;;  %v7132_v42 = vand.u32 4294901760, %v5968_v2  ;;  %v6014_v44 = vsub.f32 %v698_v38, %v698_v38  ;;  %v7425_v56 = vld [vmem:[#allocation59_spill] sm:$0xff]  ;;  %1480 = vmatprep.subr.mxu1 %v1479_v45 }
 0x131   :  { %1262 = vmatprep.subr.mxu0 %v7423_v32  ;;  %v1503_v55 = vsub.f32 %v5807_v37, %v7424_v59  ;;  %vm7129_vm2 = vcmp.eq.s32.totalorder %v7425_v56, %v7349_v43  ;;  %v7426_v17 = vand.u32 4294901760, %v7325_v60  ;;  %v1489_v23 = vand.u32 4294901760, %v1488_v54  ;;  %1485 = vmatpush1.msra.mxu1 %v1484_v49 }
 0x132   :  { %vm7427_vm3 = vcmp.eq.s32.totalorder %v7374_v47, %v7353_v3  ;;  %v7428_v38 = vand.u32 4294901760, %v7327_v61  ;;  %v1494_v32 = vand.u32 4294901760, %v1493_v29  ;;  %v1508_v45 = vsub.f32 %v5940_v31, %v7133_v52 }
 0x133   :  { %1265 = vmatpush1.msra.mxu0 %v7426_v17  ;;  %v690_v48 = vsel %vm7427_vm3, 1.0, %v7233_v9  ;;  %v7130_v60 = vand.u32 4294901760, %v5994_v10  ;;  %v6033_v54 = vsub.f32 %v694_v21, %v694_v21  ;;  %1490 = vmatprep.subr.mxu1 %v1489_v23  ;;  %v7429_v17 = vand.u32 4294901760, %v7329_v62 }
 0x134   :  { %1268 = vmatprep.subr.mxu0 %v7428_v38  ;;  %v1499_v59 = vand.u32 4294901760, %v1498_v1  ;;  %v7430_v27 = vand.u32 4294901760, %v5841_v25  ;;  %v7131_v61 = vand.u32 4294901760, %v5872_v18  ;;  %vm7431_vm3 = vcmp.eq.s32.totalorder %v7381_v8, %v7353_v3  ;;  %1495 = vmatpush1.msra.mxu1 %v1494_v32 }
 0x135   :  { %1271 = vmatpush1.msra.mxu0 %v7429_v17  ;;  %v686_v29 = vsel %vm7431_vm3, 1.0, %v7233_v9  ;;  %v7432_v21 = vand.u32 4294901760, %v5521_v6  ;;  %v1504_v23 = vand.u32 4294901760, %v1503_v55  ;;  %v1518_v62 = vsub.f32 %v5968_v2, %v7132_v42 }
 0x136   :  { %v1513_v49 = vsub.f32 %v5841_v25, %v7430_v27  ;;  %v7134_v1 = vand.u32 4294901760, %v6014_v44  ;;  %v6051_v38 = vsub.f32 %v690_v48, %v690_v48  ;;  %v6057_v27 = vsel %vm7129_vm2, 1.0, %v7233_v9  ;;  %1500 = vmatprep.subr.mxu1 %v1499_v59 }
 0x137   :  { %1274 = vmatprep.subr.mxu0 %v7432_v21  ;;  %v7433_v32 = vand.u32 4294901760, %v5481_v24  ;;  %v7434_v6 = vand.u32 4294901760, %v5839_v35  ;;  %v7135_v17 = vand.u32 4294901760, %v5874_v15  ;;  %vm7435_vm3 = vcmp.eq.s32.totalorder %v7383_v26, %v7353_v3  ;;  %1505 = vmatpush1.msra.mxu1 %v1504_v23 }
 0x138   :  { %v682_v48 = vsel %vm7435_vm3, 1.0, %v7233_v9  ;;  %v1509_v21 = vand.u32 4294901760, %v1508_v45  ;;  %v1528_v24 = vsub.f32 %v5994_v10, %v7130_v60  ;;  %v7136_v59 = vand.u32 4294901760, %v6033_v54 }
 0x139   :  { %1277 = vmatpush1.msra.mxu0 %v7433_v32  ;;  %v1523_v55 = vsub.f32 %v5839_v35, %v7434_v6  ;;  %v6074_v32 = vsub.f32 %v686_v29, %v686_v29  ;;  %vm7436_vm2 = vcmp.eq.s32.totalorder %v7352_v50, %v7353_v3  ;;  %v1514_v6 = vand.u32 4294901760, %v1513_v49 }
 0x13a   :  { %1312 = vmatmul.mubr.f32.vlgmr.msra.gmra.mxu0 %v7418_v58  ;;  %4360 = vmatprep.subr.msk.mxu0 %vm7436_vm2, %v7232_v0  ;;  %v1533_v45 = vsub.f32 %v5872_v18, %v7131_v61  ;;  %v7137_v23 = vand.u32 4294901760, %v5884_v34  ;;  %vm7437_vm3 = vcmp.eq.s32.totalorder %v7393_v30, %v7353_v3  ;;  %vm7438_vm9 = vcmp.eq.s32.totalorder %v7352_v50, %v7349_v43 }
 0x13b   :  { %v678_v29 = vsel %vm7437_vm3, 1.0, %v7233_v9  ;;  %1510 = vmatprep.subr.mxu1 %v1509_v21  ;;  %4361 = vmatpush1.msk.msra.mxu0 %vm7438_vm9, %v7232_v0  ;;  %v1519_v60 = vand.u32 4294901760, %v1518_v62  ;;  %v1538_v49 = vsub.f32 %v6014_v44, %v7134_v1  ;;  %v7138_v61 = vand.u32 4294901760, %v6051_v38 }
 0x13c   :  { %v6097_v42 = vsub.f32 %v682_v48, %v682_v48  ;;  %1515 = vmatpush1.msra.mxu1 %v1514_v6  ;;  %vm7439_vm2 = vcmp.eq.s32.totalorder %v7358_v13, %v7353_v3  ;;  %v1524_v21 = vand.u32 4294901760, %v1523_v55  ;;  %v1543_v52 = vsub.f32 %v5874_v15, %v7135_v17  ;;  %1454 = vmatprep.mubr.f32.mxu0 %v7233_v9 }
 0x13d   :  { %4362 = vmatprep.subr.msk.mxu0 %vm7439_vm2, %v7232_v0  ;;  %vm7440_vm9 = vcmp.eq.s32.totalorder %v7396_v40, %v7353_v3  ;;  %1520 = vmatprep.subr.mxu1 %v1519_v60  ;;  %vm7441_vm3 = vcmp.eq.s32.totalorder %v7358_v13, %v7349_v43  ;;  %v1529_v48 = vand.u32 4294901760, %v1528_v24  ;;  %v1548_v55 = vsub.f32 %v6033_v54, %v7136_v59 }
 0x13e   :  { %v674_v1 = vsel %vm7440_vm9, 1.0, %v7233_v9  ;;  %4363 = vmatpush1.msk.msra.mxu0 %vm7441_vm3, %v7232_v0  ;;  %v6119_v17 = vsub.f32 %v678_v29, %v678_v29  ;;  %1525 = vmatpush1.msra.mxu1 %v1524_v21  ;;  %vm7442_vm2 = vcmp.eq.s32.totalorder %v7348_v28, %v7353_v3  ;;  %v1534_v60 = vand.u32 4294901760, %v1533_v45 }
 0x13f   :  { %4364 = vmatprep.subr.msk.mxu0 %vm7442_vm2, %v7232_v0  ;;  %v1553_v62 = vsub.f32 %v5884_v34, %v7137_v23  ;;  %vm7443_vm9 = vcmp.eq.s32.totalorder %v7401_v53, %v7353_v3  ;;  %1530 = vmatprep.subr.mxu1 %v1529_v48  ;;  %vm7444_vm3 = vcmp.eq.s32.totalorder %v7348_v28, %v7349_v43  ;;  %v1539_v29 = vand.u32 4294901760, %v1538_v49 }
 0x140   :  { %v670_v59 = vsel %vm7443_vm9, 1.0, %v7233_v9  ;;  %4365 = vmatpush1.msk.msra.mxu0 %vm7444_vm3, %v7232_v0  ;;  %v1558_v45 = vsub.f32 %v6051_v38, %v7138_v61  ;;  %v6141_v23 = vsub.f32 %v674_v1, %v674_v1  ;;  %1535 = vmatpush1.msra.mxu1 %v1534_v60  ;;  %vm7445_vm2 = vcmp.eq.s32.totalorder %v7356_v11, %v7353_v3 }
 0x141   :  { %4366 = vmatprep.subr.msk.mxu0 %vm7445_vm2, %v7232_v0  ;;  %v1544_v48 = vand.u32 4294901760, %v1543_v52  ;;  %v7446_v24 = vand.u32 4294901760, %v5876_v4  ;;  %vm7447_vm9 = vcmp.eq.s32.totalorder %v7425_v56, %v7353_v3  ;;  %1540 = vmatprep.subr.mxu1 %v1539_v29  ;;  %vm7448_vm3 = vcmp.eq.s32.totalorder %v7356_v11, %v7349_v43 }
 0x142   :  { %v666_v61 = vsel %vm7447_vm9, 1.0, %v7233_v9  ;;  %4367 = vmatpush1.msk.msra.mxu0 %vm7448_vm3, %v7232_v0  ;;  %v1549_v1 = vand.u32 4294901760, %v1548_v55  ;;  %v7449_v52 = vand.u32 4294901760, %v6074_v32  ;;  %v6163_v21 = vsub.f32 %v670_v59, %v670_v59 }
 0x143   :  { %v1563_v6 = vsub.f32 %v5876_v4, %v7446_v24  ;;  %v6167_v49 = vsub.f32 %v5974_v57, %v5974_v57  ;;  %1545 = vmatpush1.msra.mxu1 %v1544_v48  ;;  %vm7450_vm2 = vcmp.eq.s32.totalorder %v7365_v16, %v7353_v3  ;;  %v1554_v29 = vand.u32 4294901760, %v1553_v62 }
 0x144   :  { %v1568_v60 = vsub.f32 %v6074_v32, %v7449_v52  ;;  %4368 = vmatprep.subr.msk.mxu0 %vm7450_vm2, %v7232_v0  ;;  %v7451_v55 = vand.u32 4294901760, %v5898_v20  ;;  %1550 = vmatprep.subr.mxu1 %v1549_v1  ;;  %vm7452_vm9 = vcmp.eq.s32.totalorder %v7365_v16, %v7349_v43  ;;  %v1559_v57 = vand.u32 4294901760, %v1558_v45 }
 0x145   :  { %4369 = vmatpush1.msk.msra.mxu0 %vm7452_vm9, %v7232_v0  ;;  %v7453_v59 = vand.u32 4294901760, %v6097_v42  ;;  %v6185_v62 = vsub.f32 %v666_v61, %v666_v61  ;;  %1555 = vmatpush1.msra.mxu1 %v1554_v29  ;;  %vm7454_vm3 = vcmp.eq.s32.totalorder %v7363_v5, %v7353_v3  ;;  %v1564_v1 = vand.u32 4294901760, %v1563_v6 }
 0x146   :  { %v1573_v4 = vsub.f32 %v5898_v20, %v7451_v55  ;;  %v6189_v55 = vsub.f32 %v6057_v27, %v6057_v27  ;;  %4370 = vmatprep.subr.msk.mxu0 %vm7454_vm3, %v7232_v0  ;;  %v7455_v45 = vand.u32 4294901760, %v5900_v19  ;;  %1560 = vmatprep.subr.mxu1 %v1559_v57  ;;  %vm7456_vm2 = vcmp.eq.s32.totalorder %v7363_v5, %v7349_v43 }
 0x147   :  { %v1578_v48 = vsub.f32 %v6097_v42, %v7453_v59  ;;  %4371 = vmatpush1.msk.msra.mxu0 %vm7456_vm2, %v7232_v0  ;;  %v1569_v61 = vand.u32 4294901760, %v1568_v60  ;;  %v7457_v27 = vand.u32 4294901760, %v6119_v17  ;;  %1565 = vmatpush1.msra.mxu1 %v1564_v1  ;;  %vm7458_vm9 = vcmp.eq.s32.totalorder %v7370_v7, %v7353_v3 }
 0x148   :  { %v1583_v52 = vsub.f32 %v5900_v19, %v7455_v45  ;;  %4372 = vmatprep.subr.msk.mxu0 %vm7458_vm9, %v7232_v0  ;;  %v1574_v6 = vand.u32 4294901760, %v1573_v4  ;;  %v7459_v57 = vand.u32 4294901760, %v5942_v63  ;;  %vm7460_vm3 = vcmp.eq.s32.totalorder %v7370_v7, %v7349_v43 }
 0x149   :  { %v1588_v29 = vsub.f32 %v6119_v17, %v7457_v27  ;;  %1570 = vmatprep.subr.mxu1 %v1569_v61  ;;  %4373 = vmatpush1.msk.msra.mxu0 %vm7460_vm3, %v7232_v0  ;;  %v1579_v60 = vand.u32 4294901760, %v1578_v48  ;;  %v7461_v1 = vand.u32 4294901760, %v6141_v23  ;;  %v1617_v24 = vand.u32 4294901760, %v6185_v62 }
 0x14a   :  { %v1593_v45 = vsub.f32 %v5942_v63, %v7459_v57  ;;  %1575 = vmatpush1.msra.mxu1 %v1574_v6  ;;  %vm7462_vm2 = vcmp.eq.s32.totalorder %v7372_v12, %v7353_v3  ;;  %v1584_v4 = vand.u32 4294901760, %v1583_v52  ;;  %v7463_v61 = vand.u32 4294901760, %v5957_v14 }
 0x14b   :  { %v1598_v27 = vsub.f32 %v6141_v23, %v7461_v1  ;;  %4374 = vmatprep.subr.msk.mxu0 %vm7462_vm2, %v7232_v0  ;;  %v1622_v59 = vand.u32 4294901760, %v6189_v55  ;;  %1580 = vmatprep.subr.mxu1 %v1579_v60  ;;  %vm7464_vm9 = vcmp.eq.s32.totalorder %v7372_v12, %v7349_v43  ;;  %v1589_v48 = vand.u32 4294901760, %v1588_v29 }
 0x14c   :  { %v1603_v57 = vsub.f32 %v5957_v14, %v7463_v61  ;;  %4375 = vmatpush1.msk.msra.mxu0 %vm7464_vm9, %v7232_v0  ;;  %v7465_v6 = vand.u32 4294901760, %v6163_v21  ;;  %1585 = vmatpush1.msra.mxu1 %v1584_v4  ;;  %vm7466_vm3 = vcmp.eq.s32.totalorder %v7377_v22, %v7353_v3  ;;  %v1594_v52 = vand.u32 4294901760, %v1593_v45 }
 0x14d   :  { %4376 = vmatprep.subr.msk.mxu0 %vm7466_vm3, %v7232_v0  ;;  %v7467_v61 = vand.u32 4294901760, %v6167_v49  ;;  %1590 = vmatprep.subr.mxu1 %v1589_v48  ;;  %vm7468_vm2 = vcmp.eq.s32.totalorder %v7377_v22, %v7349_v43  ;;  %v1599_v29 = vand.u32 4294901760, %v1598_v27  ;;  %v1618_v4 = vsub.f32 %v6185_v62, %v1617_v24 }
 0x14e   :  { %v1608_v1 = vsub.f32 %v6163_v21, %v7465_v6  ;;  %4377 = vmatpush1.msk.msra.mxu0 %vm7468_vm2, %v7232_v0  ;;  %1595 = vmatpush1.msra.mxu1 %v1594_v52  ;;  %vm7469_vm9 = vcmp.eq.s32.totalorder %v7374_v47, %v7353_v3  ;;  %v1604_v45 = vand.u32 4294901760, %v1603_v57  ;;  %v1623_v48 = vsub.f32 %v6189_v55, %v1622_v59  ;;  %v7491_v52 = vld [vmem:[#allocation76_spill] sm:$0xff] }
 0x14f   :  { %v1613_v60 = vsub.f32 %v6167_v49, %v7467_v61  ;;  %4378 = vmatprep.subr.msk.mxu0 %vm7469_vm9, %v7232_v0  ;;  %1600 = vmatprep.subr.mxu1 %v1599_v29  ;;  %vm7470_vm3 = vcmp.eq.s32.totalorder %v7374_v47, %v7349_v43  ;;  %vm7471_vm2 = vcmp.eq.s32.totalorder %v7381_v8, %v7353_v3  ;;  %v1619_v57 = vand.u32 4294901760, %v1618_v4  ;;  %v7496_v61 = vld [vmem:[#allocation51_spill] sm:$0xff] }
 0x150   :  { %4379 = vmatpush1.msk.msra.mxu0 %vm7470_vm3, %v7232_v0  ;;  %v1609_v27 = vand.u32 4294901760, %v1608_v1  ;;  %1605 = vmatpush1.msra.mxu1 %v1604_v45  ;;  %vm7472_vm9 = vcmp.eq.s32.totalorder %v7381_v8, %v7349_v43  ;;  %vm7473_vm3 = vcmp.eq.s32.totalorder %v7383_v26, %v7353_v3  ;;  %v1624_v1 = vand.u32 4294901760, %v1623_v48  ;;  %v7518_v29 = vld [vmem:[#allocation75_spill] sm:$0xff] }
 0x151   :  { %4380 = vmatprep.subr.msk.mxu0 %vm7471_vm2, %v7232_v0  ;;  %v1614_v6 = vand.u32 4294901760, %v1613_v60  ;;  %vm7474_vm2 = vcmp.eq.s32.totalorder %v7383_v26, %v7349_v43  ;;  %vm7477_vm8 = vcmp.eq.s32.totalorder %v7393_v30, %v7349_v43  ;;  %vm7480_vm4 = vcmp.eq.s32.totalorder %v7358_v13, %v7353_v3  ;;  %v7512_v60 = vld [vmem:[#allocation48_spill] sm:$0xff] }
 0x152   :  { %1610 = vmatprep.subr.mxu1 %v1609_v27  ;;  %4381 = vmatpush1.msk.msra.mxu0 %vm7472_vm9, %v7232_v0  ;;  %vm7475_vm9 = vcmp.eq.s32.totalorder %v7393_v30, %v7353_v3 }
 0x153   :  { %1615 = vmatpush1.msra.mxu1 %v1614_v6  ;;  %4382 = vmatprep.subr.msk.mxu0 %vm7473_vm3, %v7232_v0  ;;  %vm7476_vm3 = vcmp.eq.s32.totalorder %v7352_v50, %v7353_v3 }
 0x154   :  { %1620 = vmatprep.subr.mxu1 %v1619_v57  ;;  %4383 = vmatpush1.msk.msra.mxu0 %vm7474_vm2, %v7232_v0  ;;  %vm7478_vm2 = vcmp.eq.s32.totalorder %v7352_v50, %v7349_v43  ;;  %v7584_v57 = vld [vmem:[#allocation10_spill] sm:$0xff] }
 0x155   :  { %1625 = vmatpush1.msra.mxu1 %v1624_v1  ;;  %4384 = vmatprep.subr.msk.mxu0 %vm7475_vm9, %v7232_v0  ;;  %vm7479_vm9 = vcmp.eq.s32.totalorder %v7396_v40, %v7353_v3  ;;  %v7587_v1 = vld [vmem:[#allocation11_spill] sm:$0xff] }
 0x156   :  { %1660 = vmatmul.mubr.f32.vlgmr.msra.gmra.mxu1 %v7418_v58  ;;  %4392 = vmatprep.subr.msk.mxu1 %vm7476_vm3, %v7232_v0  ;;  %vm7481_vm3 = vcmp.eq.s32.totalorder %v7396_v40, %v7349_v43 }
 0x157   :  { %4385 = vmatpush1.msk.msra.mxu0 %vm7477_vm8, %v7232_v0  ;;  %4393 = vmatpush1.msk.msra.mxu1 %vm7478_vm2, %v7232_v0  ;;  %vm7482_vm8 = vcmp.eq.s32.totalorder %v7358_v13, %v7349_v43  ;;  %vm7483_vm2 = vcmp.eq.s32.totalorder %v7401_v53, %v7353_v3 }
 0x158   :  { %4386 = vmatprep.subr.msk.mxu0 %vm7479_vm9, %v7232_v0  ;;  %4394 = vmatprep.subr.msk.mxu1 %vm7480_vm4, %v7232_v0  ;;  %vm7484_vm9 = vcmp.eq.s32.totalorder %v7348_v28, %v7353_v3  ;;  %vm7485_vm4 = vcmp.eq.s32.totalorder %v7401_v53, %v7349_v43 }
 0x159   :  { %4387 = vmatpush1.msk.msra.mxu0 %vm7481_vm3, %v7232_v0  ;;  %4395 = vmatpush1.msk.msra.mxu1 %vm7482_vm8, %v7232_v0  ;;  %vm7486_vm3 = vcmp.eq.s32.totalorder %v7348_v28, %v7349_v43  ;;  %vm7487_vm8 = vcmp.eq.s32.totalorder %v7425_v56, %v7353_v3 }
 0x15a   :  { %4388 = vmatprep.subr.msk.mxu0 %vm7483_vm2, %v7232_v0  ;;  %4396 = vmatprep.subr.msk.mxu1 %vm7484_vm9, %v7232_v0  ;;  %vm7488_vm2 = vcmp.eq.s32.totalorder %v7356_v11, %v7353_v3  ;;  %vm7489_vm9 = vcmp.eq.s32.totalorder %v7425_v56, %v7349_v43 }
 0x15b   :  { %4389 = vmatpush1.msk.msra.mxu0 %vm7485_vm4, %v7232_v0  ;;  %4397 = vmatpush1.msk.msra.mxu1 %vm7486_vm3, %v7232_v0  ;;  %vm7490_vm4 = vcmp.eq.s32.totalorder %v7356_v11, %v7349_v43  ;;  %vm7492_vm3 = vcmp.eq.s32.totalorder %v7365_v16, %v7353_v3 }
 0x15c   :  { %4390 = vmatprep.subr.msk.mxu0 %vm7487_vm8, %v7232_v0  ;;  %4398 = vmatprep.subr.msk.mxu1 %vm7488_vm2, %v7232_v0  ;;  %vm7493_vm8 = vcmp.eq.s32.totalorder %v7365_v16, %v7349_v43  ;;  %vm7494_vm2 = vcmp.eq.s32.totalorder %v7363_v5, %v7353_v3 }
 0x15d   :  { %4391 = vmatpush1.msk.msra.mxu0 %vm7489_vm9, %v7232_v0  ;;  %4399 = vmatpush1.msk.msra.mxu1 %vm7490_vm4, %v7232_v0  ;;  %vm7495_vm9 = vcmp.eq.s32.totalorder %v7363_v5, %v7349_v43  ;;  %vm7497_vm4 = vcmp.eq.s32.totalorder %v7370_v7, %v7353_v3 }
 0x15e   :  { %1460 = vmatmul.mubr.f32.vlgmr.msra.gmra.mxu0 %v7491_v52  ;;  %1667 = vmatprep.subr.mxu0 %v5803_v36  ;;  %v7589_v52 = vld [vmem:[#allocation15_spill] sm:$0xff] }
 0x15f   :  { %4400 = vmatprep.subr.msk.mxu1 %vm7492_vm3, %v7232_v0  ;;  %1669 = vmatpush1.msra.mxu0 %v5805_v46  ;;  %vm7498_vm3 = vcmp.eq.s32.totalorder %v7370_v7, %v7349_v43  ;;  %vm7590_vm13 = vnez %v7589_v52 }
 0x160   :  { %4401 = vmatpush1.msk.msra.mxu1 %vm7493_vm8, %v7232_v0  ;;  %1671 = vmatprep.subr.mxu0 %v5837_v51  ;;  %vm7499_vm8 = vcmp.eq.s32.totalorder %v7372_v12, %v7353_v3 }
 0x161   :  { %4402 = vmatprep.subr.msk.mxu1 %vm7494_vm2, %v7232_v0  ;;  %1673 = vmatpush1.msra.mxu0 %v5809_v33  ;;  %vm7500_vm2 = vcmp.eq.s32.totalorder %v7372_v12, %v7349_v43 }
 0x162   :  { %4403 = vmatpush1.msk.msra.mxu1 %vm7495_vm9, %v7232_v0  ;;  %1675 = vmatprep.subr.mxu0 %v7496_v61  ;;  %vm7501_vm9 = vcmp.eq.s32.totalorder %v7377_v22, %v7353_v3 }
 0x163   :  { %4404 = vmatprep.subr.msk.mxu1 %vm7497_vm4, %v7232_v0  ;;  %1677 = vmatpush1.msra.mxu0 %v5788_v41  ;;  %vm7502_vm4 = vcmp.eq.s32.totalorder %v7377_v22, %v7349_v43 }
 0x164   :  { %4405 = vmatpush1.msk.msra.mxu1 %vm7498_vm3, %v7232_v0  ;;  %1679 = vmatprep.subr.mxu0 %v5892_v39  ;;  %vm7503_vm3 = vcmp.eq.s32.totalorder %v7374_v47, %v7353_v3 }
 0x165   :  { %4406 = vmatprep.subr.msk.mxu1 %vm7499_vm8, %v7232_v0  ;;  %1681 = vmatpush1.msra.mxu0 %v5807_v37  ;;  %vm7504_vm8 = vcmp.eq.s32.totalorder %v7374_v47, %v7349_v43 }
 0x166   :  { %4407 = vmatpush1.msk.msra.mxu1 %vm7500_vm2, %v7232_v0  ;;  %1683 = vmatprep.subr.mxu0 %v5940_v31  ;;  %vm7505_vm2 = vcmp.eq.s32.totalorder %v7381_v8, %v7353_v3 }
 0x167   :  { %4408 = vmatprep.subr.msk.mxu1 %vm7501_vm9, %v7232_v0  ;;  %1685 = vmatpush1.msra.mxu0 %v5841_v25  ;;  %vm7506_vm9 = vcmp.eq.s32.totalorder %v7381_v8, %v7349_v43 }
 0x168   :  { %4409 = vmatpush1.msk.msra.mxu1 %vm7502_vm4, %v7232_v0  ;;  %1687 = vmatprep.subr.mxu0 %v5968_v2  ;;  %vm7507_vm4 = vcmp.eq.s32.totalorder %v7383_v26, %v7353_v3 }
 0x169   :  { %4410 = vmatprep.subr.msk.mxu1 %vm7503_vm3, %v7232_v0  ;;  %1689 = vmatpush1.msra.mxu0 %v5839_v35  ;;  %vm7508_vm3 = vcmp.eq.s32.totalorder %v7383_v26, %v7349_v43 }
 0x16a   :  { %4411 = vmatpush1.msk.msra.mxu1 %vm7504_vm8, %v7232_v0  ;;  %1691 = vmatprep.subr.mxu0 %v5994_v10  ;;  %vm7509_vm8 = vcmp.eq.s32.totalorder %v7393_v30, %v7353_v3 }
 0x16b   :  { %4412 = vmatprep.subr.msk.mxu1 %vm7505_vm2, %v7232_v0  ;;  %1693 = vmatpush1.msra.mxu0 %v5872_v18  ;;  %vm7510_vm2 = vcmp.eq.s32.totalorder %v7393_v30, %v7349_v43 }
 0x16c   :  { %4413 = vmatpush1.msk.msra.mxu1 %vm7506_vm9, %v7232_v0  ;;  %1695 = vmatprep.subr.mxu0 %v6014_v44  ;;  %vm7511_vm9 = vcmp.eq.s32.totalorder %v7396_v40, %v7353_v3 }
 0x16d   :  { %4414 = vmatprep.subr.msk.mxu1 %vm7507_vm4, %v7232_v0  ;;  %1697 = vmatpush1.msra.mxu0 %v5874_v15  ;;  %vm7513_vm4 = vcmp.eq.s32.totalorder %v7396_v40, %v7349_v43 }
 0x16e   :  { %4415 = vmatpush1.msk.msra.mxu1 %vm7508_vm3, %v7232_v0  ;;  %1699 = vmatprep.subr.mxu0 %v6033_v54  ;;  %vm7514_vm3 = vcmp.eq.s32.totalorder %v7401_v53, %v7353_v3 }
 0x16f   :  { %4416 = vmatprep.subr.msk.mxu1 %vm7509_vm8, %v7232_v0  ;;  %1701 = vmatpush1.msra.mxu0 %v5884_v34  ;;  %vm7515_vm8 = vcmp.eq.s32.totalorder %v7401_v53, %v7349_v43 }
 0x170   :  { %4417 = vmatpush1.msk.msra.mxu1 %vm7510_vm2, %v7232_v0  ;;  %1703 = vmatprep.subr.mxu0 %v6051_v38  ;;  %vm7516_vm2 = vcmp.eq.s32.totalorder %v7425_v56, %v7353_v3 }
 0x171   :  { %4418 = vmatprep.subr.msk.mxu1 %vm7511_vm9, %v7232_v0  ;;  %1705 = vmatpush1.msra.mxu0 %v7512_v60  ;;  %vm7517_vm9 = vcmp.eq.s32.totalorder %v7425_v56, %v7349_v43 }
 0x172   :  { %4419 = vmatpush1.msk.msra.mxu1 %vm7513_vm4, %v7232_v0  ;;  %1707 = vmatprep.subr.mxu0 %v6074_v32  ;;  %vm7519_vm4 = vcmp.eq.s32.totalorder %v7352_v50, %v7353_v3 }
 0x173   :  { %4420 = vmatprep.subr.msk.mxu1 %vm7514_vm3, %v7232_v0  ;;  %1709 = vmatpush1.msra.mxu0 %v5898_v20  ;;  %vm7520_vm3 = vcmp.eq.s32.totalorder %v7352_v50, %v7349_v43  ;;  %v7527_v50 = vld [vmem:[#allocation74_spill] sm:$0xff] }
 0x174   :  { %4421 = vmatpush1.msk.msra.mxu1 %vm7515_vm8, %v7232_v0  ;;  %1711 = vmatprep.subr.mxu0 %v6097_v42  ;;  %vm7521_vm8 = vcmp.eq.s32.totalorder %v7358_v13, %v7353_v3 }
 0x175   :  { %4422 = vmatprep.subr.msk.mxu1 %vm7516_vm2, %v7232_v0  ;;  %1713 = vmatpush1.msra.mxu0 %v5900_v19  ;;  %vm7522_vm2 = vcmp.eq.s32.totalorder %v7358_v13, %v7349_v43  ;;  %v7530_v13 = vand.u32 4294901760, %v5805_v46  ;;  %v7536_v46 = vand.u32 4294901760, %v7496_v61  ;;  %v7591_v61 = vld [vmem:[#allocation14_spill] sm:$0xff] }
 0x176   :  { %4423 = vmatpush1.msk.msra.mxu1 %vm7517_vm9, %v7232_v0  ;;  %1835 = vmatprep.mubr.f32.mxu1 %v7233_v9  ;;  %vm7523_vm9 = vcmp.eq.s32.totalorder %v7348_v28, %v7353_v3 }
 0x177   :  { %1715 = vmatprep.subr.mxu0 %v6119_v17  ;;  %1839 = vmatmul.mubr.f32.vlgmr.msra.gmra.mxu1 %v7518_v29  ;;  %v7594_v29 = vld [vmem:[#allocation19_spill] sm:$0xff] }
 0x178   :  { %4424 = vmatprep.subr.msk.mxu1 %vm7519_vm4, %v7232_v0  ;;  %1717 = vmatpush1.msra.mxu0 %v5942_v63  ;;  %vm7524_vm4 = vcmp.eq.s32.totalorder %v7348_v28, %v7349_v43  ;;  %v7528_v28 = vand.u32 4294901760, %v5803_v36  ;;  %v7534_v36 = vand.u32 4294901760, %v5809_v33  ;;  %v7540_v33 = vand.u32 4294901760, %v5892_v39 }
 0x179   :  { %4425 = vmatpush1.msk.msra.mxu1 %vm7520_vm3, %v7232_v0  ;;  %1719 = vmatprep.subr.mxu0 %v6141_v23  ;;  %vm7525_vm3 = vcmp.eq.s32.totalorder %v7356_v11, %v7353_v3  ;;  %v7576_v39 = vand.u32 4294901760, %v6119_v17 }
 0x17a   :  { %4426 = vmatprep.subr.msk.mxu1 %vm7521_vm8, %v7232_v0  ;;  %1721 = vmatpush1.msra.mxu0 %v5957_v14  ;;  %vm7526_vm8 = vcmp.eq.s32.totalorder %v7356_v11, %v7349_v43  ;;  %v7532_v11 = vand.u32 4294901760, %v5837_v51  ;;  %v7538_v51 = vand.u32 4294901760, %v5788_v41  ;;  %v7544_v41 = vand.u32 4294901760, %v5940_v31 }
 0x17b   :  { %4427 = vmatpush1.msk.msra.mxu1 %vm7522_vm2, %v7232_v0  ;;  %1723 = vmatprep.subr.mxu0 %v6163_v21  ;;  %vm7529_vm2 = vcmp.eq.s32.totalorder %v7365_v16, %v7353_v3  ;;  %v7550_v31 = vand.u32 4294901760, %v5839_v35  ;;  %v7556_v35 = vand.u32 4294901760, %v6014_v44 }
 0x17c   :  { %4428 = vmatprep.subr.msk.mxu1 %vm7523_vm9, %v7232_v0  ;;  %1725 = vmatpush1.msra.mxu0 %v6167_v49  ;;  %vm7531_vm9 = vcmp.eq.s32.totalorder %v7365_v16, %v7349_v43  ;;  %v7546_v16 = vand.u32 4294901760, %v5841_v25  ;;  %v7552_v25 = vand.u32 4294901760, %v5994_v10  ;;  %v7558_v10 = vand.u32 4294901760, %v5874_v15 }
 0x17d   :  { %4429 = vmatpush1.msk.msra.mxu1 %vm7524_vm4, %v7232_v0  ;;  %1727 = vmatprep.subr.mxu0 %v6185_v62  ;;  %vm7533_vm4 = vcmp.eq.s32.totalorder %v7363_v5, %v7353_v3  ;;  %v7564_v15 = vand.u32 4294901760, %v6051_v38 }
 0x17e   :  { %4430 = vmatprep.subr.msk.mxu1 %vm7525_vm3, %v7232_v0  ;;  %1729 = vmatpush1.msra.mxu0 %v6189_v55  ;;  %vm7535_vm3 = vcmp.eq.s32.totalorder %v7363_v5, %v7349_v43  ;;  %v7542_v5 = vand.u32 4294901760, %v5807_v37  ;;  %v7548_v37 = vand.u32 4294901760, %v5968_v2  ;;  %v7562_v2 = vand.u32 4294901760, %v5884_v34  ;;  %v4456_v34 = vld [vmem:[%s6911_s3 + $0x4] sm:$0xf] }
 0x17f   :  { %1762 = vmatprep.mubr.f32.mxu0 %v7233_v9  ;;  %4431 = vmatpush1.msk.msra.mxu1 %vm7526_vm8, %v7232_v0  ;;  %vm7537_vm8 = vcmp.eq.s32.totalorder %v7370_v7, %v7353_v3 }
 0x180   :  { %1765 = vmatmul.mubr.f32.vlgmr.msra.gmra.mxu0 %v7527_v50  ;;  %1847 = vmatprep.subr.mxu0 %v7528_v28  ;;  %v7596_v50 = vld [vmem:[#allocation20_spill] sm:$0xff] }
 0x181   :  { %4432 = vmatprep.subr.msk.mxu1 %vm7529_vm2, %v7232_v0  ;;  %1850 = vmatpush1.msra.mxu0 %v7530_v13  ;;  %vm7539_vm2 = vcmp.eq.s32.totalorder %v7370_v7, %v7349_v43  ;;  %v7566_v7 = vand.u32 4294901760, %v7512_v60  ;;  %v7599_v13 = vld [vmem:[#allocation23_spill] sm:$0xff] }
 0x182   :  { %4433 = vmatpush1.msk.msra.mxu1 %vm7531_vm9, %v7232_v0  ;;  %1853 = vmatprep.subr.mxu0 %v7532_v11  ;;  %vm7541_vm9 = vcmp.eq.s32.totalorder %v7372_v12, %v7353_v3 }
 0x183   :  { %4434 = vmatprep.subr.msk.mxu1 %vm7533_vm4, %v7232_v0  ;;  %1856 = vmatpush1.msra.mxu0 %v7534_v36  ;;  %vm7543_vm4 = vcmp.eq.s32.totalorder %v7372_v12, %v7349_v43  ;;  %v7568_v12 = vand.u32 4294901760, %v6074_v32  ;;  %v7602_v36 = vld [vmem:[#allocation26_spill] sm:$0xff] }
 0x184   :  { %4435 = vmatpush1.msk.msra.mxu1 %vm7535_vm3, %v7232_v0  ;;  %1859 = vmatprep.subr.mxu0 %v7536_v46  ;;  %vm7545_vm3 = vcmp.eq.s32.totalorder %v7377_v22, %v7353_v3 }
 0x185   :  { %4436 = vmatprep.subr.msk.mxu1 %vm7537_vm8, %v7232_v0  ;;  %1862 = vmatpush1.msra.mxu0 %v7538_v51  ;;  %vm7547_vm8 = vcmp.eq.s32.totalorder %v7377_v22, %v7349_v43  ;;  %v7554_v22 = vand.u32 4294901760, %v5872_v18  ;;  %v7560_v18 = vand.u32 4294901760, %v6033_v54  ;;  %v7605_v51 = vld [vmem:[#allocation29_spill] sm:$0xff] }
 0x186   :  { %4437 = vmatpush1.msk.msra.mxu1 %vm7539_vm2, %v7232_v0  ;;  %1865 = vmatprep.subr.mxu0 %v7540_v33  ;;  %vm7549_vm2 = vcmp.eq.s32.totalorder %v7374_v47, %v7353_v3  ;;  %v7607_v33 = vld [vmem:[#allocation30_spill] sm:$0xff] }
 0x187   :  { %4438 = vmatprep.subr.msk.mxu1 %vm7541_vm9, %v7232_v0  ;;  %1868 = vmatpush1.msra.mxu0 %v7542_v5  ;;  %vm7551_vm9 = vcmp.eq.s32.totalorder %v7374_v47, %v7349_v43  ;;  %v7570_v47 = vand.u32 4294901760, %v5898_v20  ;;  %v7578_v20 = vand.u32 4294901760, %v6141_v23  ;;  %v7609_v5 = vld [vmem:[#allocation31_spill] sm:$0xff] }
 0x188   :  { %4439 = vmatpush1.msk.msra.mxu1 %vm7543_vm4, %v7232_v0  ;;  %1871 = vmatprep.subr.mxu0 %v7544_v41  ;;  %vm7553_vm4 = vcmp.eq.s32.totalorder %v7381_v8, %v7353_v3  ;;  %v7611_v41 = vld [vmem:[#allocation32_spill] sm:$0xff] }
 0x189   :  { %4440 = vmatprep.subr.msk.mxu1 %vm7545_vm3, %v7232_v0  ;;  %1874 = vmatpush1.msra.mxu0 %v7546_v16  ;;  %vm7555_vm3 = vcmp.eq.s32.totalorder %v7381_v8, %v7349_v43  ;;  %v7572_v8 = vand.u32 4294901760, %v6097_v42  ;;  %v6690_v42 = vld [vmem:[%s6911_s3 + $0x14] sm:$0xf]  ;;  %v7613_v16 = vld [vmem:[#allocation35_spill] sm:$0xff] }
 0x18a   :  { %4441 = vmatpush1.msk.msra.mxu1 %vm7547_vm8, %v7232_v0  ;;  %1877 = vmatprep.subr.mxu0 %v7548_v37  ;;  %vm7557_vm8 = vcmp.eq.s32.totalorder %v7383_v26, %v7353_v3 }
 0x18b   :  { %4442 = vmatprep.subr.msk.mxu1 %vm7549_vm2, %v7232_v0  ;;  %1880 = vmatpush1.msra.mxu0 %v7550_v31  ;;  %vm7559_vm2 = vcmp.eq.s32.totalorder %v7383_v26, %v7349_v43  ;;  %v7574_v26 = vand.u32 4294901760, %v5900_v19  ;;  %v7580_v19 = vand.u32 4294901760, %v6163_v21 }
 0x18c   :  { %4443 = vmatpush1.msk.msra.mxu1 %vm7551_vm9, %v7232_v0  ;;  %1883 = vmatprep.subr.mxu0 %v7552_v25  ;;  %vm7561_vm9 = vcmp.eq.s32.totalorder %v7393_v30, %v7353_v3 }
 0x18d   :  { %4444 = vmatprep.subr.msk.mxu1 %vm7553_vm4, %v7232_v0  ;;  %1886 = vmatpush1.msra.mxu0 %v7554_v22  ;;  %vm7563_vm4 = vcmp.eq.s32.totalorder %v7393_v30, %v7349_v43 }
 0x18e   :  { %4445 = vmatpush1.msk.msra.mxu1 %vm7555_vm3, %v7232_v0  ;;  %1889 = vmatprep.subr.mxu0 %v7556_v35  ;;  %vm7565_vm3 = vcmp.eq.s32.totalorder %v7396_v40, %v7353_v3 }
 0x18f   :  { %4446 = vmatprep.subr.msk.mxu1 %vm7557_vm8, %v7232_v0  ;;  %1892 = vmatpush1.msra.mxu0 %v7558_v10  ;;  %vm7567_vm8 = vcmp.eq.s32.totalorder %v7396_v40, %v7349_v43 }
 0x190   :  { %4447 = vmatpush1.msk.msra.mxu1 %vm7559_vm2, %v7232_v0  ;;  %1895 = vmatprep.subr.mxu0 %v7560_v18  ;;  %vm7569_vm2 = vcmp.eq.s32.totalorder %v7401_v53, %v7353_v3  ;;  %v7621_v18 = vld [vmem:[#allocation45_spill] sm:$0xff] }
 0x191   :  { %4448 = vmatprep.subr.msk.mxu1 %vm7561_vm9, %v7232_v0  ;;  %1898 = vmatpush1.msra.mxu0 %v7562_v2  ;;  %vm7571_vm9 = vcmp.eq.s32.totalorder %v7401_v53, %v7349_v43  ;;  %v6684_v53 = vld [vmem:[%s6911_s3 + $0xc] sm:$0xf]  ;;  %v7623_v2 = vld [vmem:[#allocation46_spill] sm:$0xff] }
 0x192   :  { %4449 = vmatpush1.msk.msra.mxu1 %vm7563_vm4, %v7232_v0  ;;  %1901 = vmatprep.subr.mxu0 %v7564_v15  ;;  %vm7573_vm4 = vcmp.eq.s32.totalorder %v7425_v56, %v7353_v3  ;;  %v7577_v3 = vand.u32 4294901760, %v5942_v63  ;;  %v7581_v63 = vand.u32 4294901760, %v6167_v49  ;;  %v7625_v15 = vld [vmem:[#allocation49_spill] sm:$0xff] }
 0x193   :  { %4450 = vmatprep.subr.msk.mxu1 %vm7565_vm3, %v7232_v0  ;;  %1904 = vmatpush1.msra.mxu0 %v7566_v7  ;;  %vm7575_vm3 = vcmp.eq.s32.totalorder %v7425_v56, %v7349_v43  ;;  %v7579_v43 = vand.u32 4294901760, %v5957_v14  ;;  %v7627_v7 = vld [vmem:[#allocation50_spill] sm:$0xff] }
 0x194   :  { %4451 = vmatpush1.msk.msra.mxu1 %vm7567_vm8, %v7232_v0  ;;  %1907 = vmatprep.subr.mxu0 %v7568_v12  ;;  %vm7582_vm8 = vcmask 1043456   ;;  %v7629_v12 = vld [vmem:[#allocation53_spill] sm:$0xff] }
 0x195   :  { %4452 = vmatprep.subr.msk.mxu1 %vm7569_vm2, %v7232_v0  ;;  %1910 = vmatpush1.msra.mxu0 %v7570_v47  ;;  %vm7583_vm2 = vmmov %vm7582_vm8  ;;  %v7631_v47 = vld [vmem:[#allocation58_spill] sm:$0xff] }
 0x196   :  { %4453 = vmatpush1.msk.msra.mxu1 %vm7571_vm9, %v7232_v0  ;;  %1913 = vmatprep.subr.mxu0 %v7572_v8  ;;  %vm7585_vm9 = vnez %v7584_v57  ;;  %v7633_v8 = vld [vmem:[#allocation57_spill] sm:$0xff] }
 0x197   :  { %4454 = vmatprep.subr.msk.mxu1 %vm7573_vm4, %v7232_v0  ;;  %1916 = vmatpush1.msra.mxu0 %v7574_v26  ;;  %vm7586_vm4 = vcmask 31744   ;;  %v7635_v26 = vld [vmem:[#allocation64_spill] sm:$0xff] }
 0x198   :  { %4455 = vmatpush1.msk.msra.mxu1 %vm7575_vm3, %v7232_v0  ;;  %2045 = vmatprep.mubr.f32.mxu1 %v7233_v9  ;;  %vm7588_vm3 = vnez %v7587_v1 }
 0x199   :  { %1919 = vmatprep.subr.mxu0 %v7576_v39  ;;  %2047 = vmatmul.mubr.f32.vlgmr.msra.gmra.mxu1 %v7418_v58 }
 0x19a   :  { %1922 = vmatpush1.msra.mxu0 %v7577_v3  ;;  %1973 = vmatprep.mubr.f32.mxu0 %v7233_v9 }
 0x19b   :  { %1925 = vmatprep.subr.mxu0 %v7578_v20  ;;  %2058 = vrot.lane.b32.xlu1 %v4456_v34, %s4747_s21 }
 0x19c   :  { %1928 = vmatpush1.msra.mxu0 %v7579_v43  ;;  %2213 = vmatprep.mubr.f32.mxu1 %v7233_v9 }
 0x19d   :  { %1931 = vmatprep.subr.mxu0 %v7580_v19  ;;  %2221 = vperm.xlu0 %4727, %v4456_v34  }
 0x19e   :  { %1934 = vmatpush1.msra.mxu0 %v7581_v63 }
 0x19f   :  { %1937 = vmatprep.subr.mxu0 %v1617_v24 }
 0x1a0   :  { %1940 = vmatpush1.msra.mxu0 %v1622_v59 }
 0x1a1   :  { %1975 = vmatmul.mubr.f32.vlgmr.msra.gmra.mxu0 %v7418_v58  ;;  %3341 = vperm.xlu0 %4727, %v6684_v53  }
 0x1a2   :  { %2134 = vmatprep.mubr.f32.mxu0 %v7233_v9 }
 0x1a5   :  { %v998_v40 = vpop.f32.mrf.mxu1  ;;  %3805 = vperm.xlu0 %4727, %v6690_v42  }
 0x1a7   :  { %v1000_v56 = vpop.f32.mrf.mxu1 }
 0x1ad   :  { %v798_v30 = vpop.f32.mrf.mxu0 }
 0x1ae   :  { %v999_v58 = vadd.f32 %v998_v40, %v798_v30 }
 0x1af   :  { %v800_v14 = vpop.f32.mrf.mxu0 }
 0x1b0   :  { %v1001_v17 = vadd.f32 %v1000_v56, %v800_v14 }
 0x1c5   :  { %v1177_v54 = vpop.f32.mrf.mxu1 }
 0x1c7   :  { %v1179_v21 = vpop.f32.mrf.mxu1 }
 0x1ce   :  { %v1103_v44 = vpop.f32.mrf.mxu0 }
 0x1cf   :  { %v1104_v32 = vadd.f32 %v1103_v44, %v999_v58 }
 0x1d0   :  { %v1105_v38 = vpop.f32.mrf.mxu0 }
 0x1d1   :  { %v1106_v23 = vadd.f32 %v1105_v38, %v1001_v17  ;;  %v1178_v24 = vadd.f32 %v1177_v54, %v1104_v32 }
 0x1d3   :  { %v1180_v55 = vadd.f32 %v1179_v21, %v1106_v23 }
 0x1ec   :  { %v1385_v49 = vpop.f32.mrf.mxu1 }
 0x1ee   :  { %v1387_v48 = vpop.f32.mrf.mxu1 }
 0x1fa   :  { %v1313_v62 = vpop.f32.mrf.mxu0 }
 0x1fb   :  { %v1314_v59 = vadd.f32 %v1313_v62, %v1178_v24 }
 0x1fc   :  { %v1315_v4 = vpop.f32.mrf.mxu0 }
 0x1fd   :  { %v1316_v45 = vadd.f32 %v1315_v4, %v1180_v55  ;;  %v6695_v6 = vadd.f32 %v1385_v49, %v1314_v59  ;;  %v4457_v59 = vld [vmem:[%s6911_s3 + $0x8] sm:$0xf]  ;;  %v6811_v4 = vld [vmem:[%s6911_s3 + $0x10] sm:$0xf] }
 0x1fe   :  { %2230 = vperm.xlu1 %4728, %v4457_v59  }
 0x1ff   :  { %v6693_v27 = vadd.f32 %v1387_v48, %v1316_v45 }
 0x201   :  { %4461 = vmatprep.subr.msk.mxu1 %vm7582_vm8, %v6693_v27  ;;  %vm7592_vm8 = vnez %v7591_v61 }
 0x202   :  { %4462 = vmatpush1.msk.msra.mxu1 %vm7583_vm2, %v6695_v6  ;;  %vm7595_vm2 = vnez %v7594_v29  ;;  %2436 = vrot.lane.b32.xlu1 %v6684_v53, %s4747_s21 }
 0x203   :  { %4467 = vmatprep.subr.msk.mxu1 %vm7585_vm9, %v7232_v0  ;;  %4463 = vmatmul.mubr.msk.f32.vlgmr.msra.gmra.mxu1 %vm7586_vm4, %v4456_v34  ;;  %vm7597_vm9 = vnez %v7596_v50  ;;  %vm7606_vm4 = vnez %v7605_v51  ;;  %v7637_v34 = vld [vmem:[#allocation61_spill] sm:$0xff] }
 0x204   :  { %4468 = vmatpush1.xpose.msk.msra.mxu1 %vm7588_vm3, %v7232_v0  ;;  %vm7610_vm3 = vnez %v7609_v5 }
 0x205   :  { %4469 = vmatprep.subr.msk.mxu1 %vm7590_vm13, %v7232_v0  ;;  %vm7600_vm13 = vnez %v7599_v13 }
 0x206   :  { %3348 = vperm.xlu1 %4728, %v6811_v4  }
 0x208   :  { %4470 = vmatpush1.xpose.msk.msra.mxu1 %vm7592_vm8, %v7232_v0  ;;  %vm7614_vm8 = vnez %v7613_v16 }
 0x209   :  { %4471 = vmatprep.subr.msk.mxu1 %vm7328_vm14, %v7232_v0  ;;  %vm7603_vm14 = vnez %v7602_v36 }
 0x20c   :  { %4472 = vmatpush1.xpose.msk.msra.mxu1 %vm7595_vm2, %v7232_v0  ;;  %vm7636_vm2 = vnez %v7635_v26 }
 0x20d   :  { %4473 = vmatprep.subr.msk.mxu1 %vm7597_vm9, %v7232_v0  ;;  %vm7638_vm9 = vnez %v7637_v34  ;;  %v2059_v55 = vpop.permute.xlu1 %2058 }
 0x210   :  { %4474 = vmatpush1.xpose.msk.msra.mxu1 %vm7332_vm10, %v7232_v0  ;;  %vm7608_vm10 = vnez %v7607_v33 }
 0x211   :  { %4475 = vmatprep.subr.msk.mxu1 %vm7600_vm13, %v7232_v0  ;;  %vm7639_vm13 = vcmask 1043456  }
 0x214   :  { %4476 = vmatpush1.xpose.msk.msra.mxu1 %vm7337_vm15, %v7232_v0  ;;  %vm7612_vm15 = vnez %v7611_v41 }
 0x215   :  { %4477 = vmatprep.subr.msk.mxu1 %vm7603_vm14, %v7232_v0  ;;  %vm7640_vm14 = vmmov %vm7639_vm13 }
 0x216   :  { %v1661_v3 = vpop.f32.mrf.mxu1 }
 0x218   :  { %4478 = vmatpush1.xpose.msk.msra.mxu1 %vm7340_vm1, %v7232_v0  ;;  %vm7622_vm1 = vnez %v7621_v18  ;;  %v1663_v19 = vpop.f32.mrf.mxu1  ;;  %v2222_v61 = vpop.permute.xlu0 %2221 }
 0x219   :  { %4479 = vmatprep.subr.msk.mxu1 %vm7606_vm4, %v7232_v0  ;;  %vm7641_vm4 = vcmask 31744  }
 0x21c   :  { %4480 = vmatpush1.xpose.msk.msra.mxu1 %vm7608_vm10, %v7232_v0  ;;  %vm7642_vm10 = vmmov %vm7639_vm13 }
 0x21d   :  { %4481 = vmatprep.subr.msk.mxu1 %vm7610_vm3, %v7232_v0  ;;  %vm7643_vm3 = vmmov %vm7642_vm10 }
 0x21e   :  { %v1461_v39 = vpop.f32.mrf.mxu0 }
 0x21f   :  { %v1662_v63 = vadd.f32 %v1661_v3, %v1461_v39 }
 0x220   :  { %4482 = vmatpush1.xpose.msk.msra.mxu1 %vm7612_vm15, %v7232_v0  ;;  %v1463_v20 = vpop.f32.mrf.mxu0  ;;  %vm7644_vm15 = vmmov %vm7641_vm4 }
 0x221   :  { %4483 = vmatprep.subr.msk.mxu1 %vm7614_vm8, %v7232_v0  ;;  %v1664_v14 = vadd.f32 %v1663_v19, %v1463_v20  ;;  %vm7645_vm8 = vmmov 0  }
 0x224   :  { %4484 = vmatpush1.xpose.msk.msra.mxu1 %vm7296_vm7, %v7232_v0  ;;  %vm7624_vm7 = vnez %v7623_v2 }
 0x225   :  { %4485 = vmatprep.subr.msk.mxu1 %vm5151_vm12, %v7232_v0  ;;  %vm7634_vm12 = vnez %v7633_v8 }
 0x228   :  { %4486 = vmatpush1.xpose.msk.msra.mxu1 %vm7297_vm6, %v7232_v0  ;;  %vm7626_vm6 = vnez %v7625_v15 }
 0x229   :  { %4487 = vmatprep.subr.msk.mxu1 %vm5195_vm0, %v7232_v0  ;;  %vm7628_vm0 = vnez %v7627_v7 }
 0x22c   :  { %4488 = vmatpush1.xpose.msk.msra.mxu1 %vm5206_vm5, %v7232_v0  ;;  %vm7630_vm5 = vnez %v7629_v12 }
 0x22d   :  { %4489 = vmatprep.subr.msk.mxu1 %vm5243_vm11, %v7232_v0  ;;  %vm7632_vm11 = vnez %v7631_v47 }
 0x230   :  { %4490 = vmatpush1.xpose.msk.msra.mxu1 %vm7622_vm1, %v7232_v0  ;;  %vm7646_vm1 = vmmov %vm7643_vm3 }
 0x231   :  { %4491 = vmatprep.subr.msk.mxu1 %vm7624_vm7, %v7232_v0  ;;  %vm7647_vm7 = vmmov %vm7646_vm1 }
 0x234   :  { %4492 = vmatpush1.xpose.msk.msra.mxu1 %vm7626_vm6, %v7232_v0 }
 0x235   :  { %4493 = vmatprep.subr.msk.mxu1 %vm7628_vm0, %v7232_v0 }
 0x237   :  { %v1840_v30 = vpop.f32.mrf.mxu1 }
 0x238   :  { %4494 = vmatpush1.xpose.msk.msra.mxu1 %vm7630_vm5, %v7232_v0 }
 0x239   :  { %4495 = vmatprep.subr.msk.mxu1 %vm7632_vm11, %v7232_v0  ;;  %v1842_v58 = vpop.f32.mrf.mxu1 }
 0x23c   :  { %4496 = vmatpush1.xpose.msk.msra.mxu1 %vm7634_vm12, %v7232_v0  ;;  %vm7648_vm12 = vmmov %vm7641_vm4 }
 0x23d   :  { %4497 = vmatprep.subr.msk.mxu1 %vm7636_vm2, %v7232_v0 }
 0x240   :  { %4498 = vmatpush1.xpose.msk.msra.mxu1 %vm7638_vm9, %v7232_v0  ;;  %v1766_v43 = vpop.f32.mrf.mxu0  ;;  %vm7650_vm9 = vmmov %vm7646_vm1 }
 0x241   :  { %4677 = vmatprep.subr.mxu1 %v7233_v9  ;;  %v1767_v44 = vadd.f32 %v1766_v43, %v1662_v63  ;;  %v2340_v43 = vld [vmem:[#allocation3] sm:$0xf] }
 0x242   :  { %v1768_v40 = vpop.f32.mrf.mxu0 }
 0x243   :  { %v1769_v56 = vadd.f32 %v1768_v40, %v1664_v14  ;;  %v1841_v38 = vadd.f32 %v1840_v30, %v1767_v44  ;;  %v7649_v44 = vld [vmem:[#allocation5_spill] sm:$0xff] }
 0x244   :  { %vm2419_vm2 = vcmp.ge.s32.totalorder %v7649_v44, 2  ;;  %v3342_v44 = vpop.permute.xlu0 %3341 }
 0x245   :  { %v1843_v32 = vadd.f32 %v1842_v58, %v1769_v56  ;;  %v4503_v56 = vld [vmem:[%s6913_s2] ss:$0 sm:$0xff] }
 0x246   :  { %v2427_v58 = vsel %vm2419_vm2, %v4503_v56, 1.0 }
 0x259   :  { %v2048_v54 = vpop.f32.mrf.mxu1 }
 0x25b   :  { %v2050_v49 = vpop.f32.mrf.mxu1 }
 0x261   :  { %v1976_v17 = vpop.f32.mrf.mxu0 }
 0x262   :  { %v1977_v23 = vadd.f32 %v1976_v17, %v1841_v38 }
 0x263   :  { %v1978_v0 = vpop.f32.mrf.mxu0 }
 0x264   :  { %v1979_v21 = vadd.f32 %v1978_v0, %v1843_v32  ;;  %v2049_v62 = vadd.f32 %v2048_v54, %v1977_v23 }
 0x266   :  { %v2051_v24 = vadd.f32 %v2050_v49, %v1979_v21  ;;  %v2314_v36 = vsub.f32 %v6695_v6, %v2049_v62 }
 0x268   :  { %4458 = vmatprep.subr.msk.mxu0 %vm7639_vm13, %v2051_v24  ;;  %v2315_v11 = vsub.f32 %v6693_v27, %v2051_v24  ;;  %v2316_v51 = vand.u32 2147483647, %v2314_v36  ;;  %vm7651_vm13 = vmmov %vm7641_vm4 }
 0x269   :  { %4459 = vmatpush1.msk.msra.mxu0 %vm7640_vm14, %v2049_v62  ;;  %v2889_v62 = vsel %vm7651_vm13, %v6684_v53, 0  ;;  %vm7652_vm14 = vmmov %vm7646_vm1 }
 0x26a   :  { %4460 = vmatmul.mubr.msk.f32.vlgmr.msra.gmra.mxu0 %vm7641_vm4, %v2059_v55  ;;  %v2317_v46 = vand.u32 2147483647, %v2315_v11  ;;  %v2318_v5 = vsel %vm7647_vm7, %v2316_v51, -inf }
 0x26b   :  { %2305 = vmatprep.mubr.f32.mxu0 %v7233_v9  ;;  %v2319_v16 = vrot.slane %v2318_v5, 4 }
 0x26c   :  { %v2325_v33 = vsel %vm7646_vm1, %v2317_v46, -inf }
 0x26d   :  { %v2326_v41 = vrot.slane %v2325_v33, 4  ;;  %v2320_v31 = vmax.f32 %v2318_v5, %v2319_v16 }
 0x26f   :  { %v2327_v37 = vmax.f32 %v2325_v33, %v2326_v41  ;;  %v2321_v22 = vrot.slane %v2320_v31, 2 }
 0x271   :  { %v2328_v25 = vrot.slane %v2327_v37, 2  ;;  %v2322_v7 = vmax.f32 %v2320_v31, %v2321_v22 }
 0x273   :  { %v2329_v27 = vmax.f32 %v2327_v37, %v2328_v25  ;;  %v2323_v12 = vrot.slane %v2322_v7, 1 }
 0x275   :  { %v2330_v6 = vrot.slane %v2329_v27, 1  ;;  %v2324_v8 = vmax.f32 %v2322_v7, %v2323_v12 }
 0x277   :  { %v2331_v47 = vmax.f32 %v2329_v27, %v2330_v6  ;;  %vm2332_vm0 = vcmp.eq.f32.partialorder %v2324_v8, 0.0 }
 0x278   :  { %vm4501_vm11 = vmneg %vm2332_vm0 }
 0x279   :  { %v2231_v10 = vpop.permute.xlu1 %2230  ;;  %vm2333_vm6 = vcmp.eq.f32.partialorder %v2331_v47, 0.0 }
 0x27a   :  { %vm4499_vm5 = vmneg %vm2333_vm6 }
 0x27d   :  { %v2437_v39 = vpop.permute.xlu1 %2436 }
 0x27e   :  { %v2438_v3 = vsel %vm7648_vm12, %v2437_v39, 0 }
 0x27f   :  { %v2509_v20 = vand.u32 4294901760, %v2438_v3 }
 0x281   :  { %v2510_v63 = vsub.f32 %v2438_v3, %v2509_v20 }
 0x283   :  { %v2511_v14 = vand.u32 4294901760, %v2510_v63 }
 0x285   :  { %v2512_v54 = vsub.f32 %v2510_v63, %v2511_v14 }
 0x287   :  { %v2513_v32 = vand.u32 4294901760, %v2512_v54 }
 0x2c3   :  { %v2215_v45 = vpop.f32.mrf.mxu1 }
 0x2c5   :  { %v2217_v1 = vpop.f32.mrf.mxu1 }
 0x32a   :  { %v2136_v48 = vpop.f32.mrf.mxu0 }
 0x32b   :  { %v2216_v57 = vadd.f32 %v2215_v45, %v2136_v48  ;;  %v4741_v45 = vld [vmem:[#allocation2] sm:$0xf] }
 0x32c   :  { %v2138_v52 = vpop.f32.mrf.mxu0  ;;  %v2892_v48 = vsel %vm7652_vm14, %v4741_v45, 0 }
 0x32d   :  { %v2218_v60 = vadd.f32 %v2217_v1, %v2138_v52  ;;  %v2224_v29 = vadd.f32 %v2222_v61, %v2216_v57  ;;  %v2925_v57 = vand.u32 4294901760, %v2892_v48 }
 0x32f   :  { %v2225_v50 = vadd.f32 %v2222_v61, %v2218_v60  ;;  %v3002_v53 = vsub.f32 %v2892_v48, %v2925_v57 }
 0x331   :  { %4729 = vtanh.f32 %v2225_v50  ;;  %v3003_v61 = vand.u32 4294901760, %v3002_v53 }
 0x332   :  { %4731 = vtanh.f32 %v2224_v29 }
 0x333   :  { %v3004_v29 = vsub.f32 %v3002_v53, %v3003_v61 }
 0x33e   :  { %v4730_v28 = vpop.eup %4729 }
 0x33f   :  { %v4732_v13 = vpop.eup %4731  ;;  %4464 = vmatprep.subr.msk.mxu0 %vm7642_vm10, %v4730_v28  ;;  %v3005_v28 = vand.u32 4294901760, %v3004_v29  ;;  %vm7653_vm10 = vmmov %vm7646_vm1 }
 0x340   :  { %4465 = vmatpush1.msk.msra.mxu0 %vm7643_vm3, %v4732_v13  ;;  %vm7654_vm3 = vmmov %vm7641_vm4 }
 0x341   :  { %4466 = vmatmul.mubr.msk.f32.vlgmr.msra.gmra.mxu0 %vm7644_vm15, %v4457_v59  ;;  %4597 = vmatprep.subr.mxu0 %v7233_v9  ;;  %v2960_v59 = vand.u32 4294901760, %v2889_v62  ;;  %vm7655_vm15 = vmmov %vm7646_vm1 }
 0x342   :  { %4599 = vmatprep.mubr.msk.f32.mxu0 %vm7645_vm8, %v7233_v9 }
 0x343   :  { %v2961_v1 = vsub.f32 %v2889_v62, %v2960_v59 }
 0x345   :  { %v2962_v52 = vand.u32 4294901760, %v2961_v1 }
 0x347   :  { %v2963_v60 = vsub.f32 %v2961_v1, %v2962_v52 }
 0x349   :  { %v2964_v50 = vand.u32 4294901760, %v2963_v60 }
 0x401   :  { %v2307_v35 = vpop.f32.mrf.mxu0 }
 0x402   :  { %v2308_v18 = vadd.f32 %v2307_v35, %v2231_v10 }
 0x403   :  { %v2309_v2 = vpop.f32.mrf.mxu0 }
 0x404   :  { %v2310_v15 = vadd.f32 %v2309_v2, %v2231_v10 }
 0x406   :  { %4733 = vtanh.f32 %v2310_v15 }
 0x407   :  { %4735 = vtanh.f32 %v2308_v18 }
 0x413   :  { %v4734_v26 = vpop.eup %4733 }
 0x414   :  { %v4736_v34 = vpop.eup %4735  ;;  %4500 = vmatprep.mubr.msk.f32.mxu1 %vm4499_vm5, %v4734_v26 }
 0x415   :  { %4502 = vmatmul.mubr.msk.f32.vlgmr.msra.gmra.mxu1 %vm4501_vm11, %v4736_v34 }
 0x416   :  { %4679 = vmatprep.mubr.msk.f32.mxu1 %vm7645_vm8, %v7233_v9 }
 0x4d5   :  { %v2407_v19 = vpop.f32.mrf.mxu1 }
 0x4d6   :  { %v2411_v30 = vadd.f32 %v2407_v19, %v2340_v43 }
 0x4d7   :  { %v2409_v40 = vpop.f32.mrf.mxu1 }
 0x4d8   :  { %2412 = vst [vmem:[#allocation3] sm:$0xf] %v2411_v30  ;;  %v3351_v30 = vsel %vm7641_vm4, %v6811_v4, 0 }
 0x4df   :  { %v2416_v38 = vld [vmem:[#allocation3] sm:$0xf] }
 0x4e0   :  { %v2428_v17 = vmul.f32 %v2427_v58, %v2416_v38  ;;  %v3422_v58 = vand.u32 4294901760, %v3351_v30 }
 0x4e2   :  { %v2441_v23 = vsel %vm7650_vm9, %v2428_v17, 0  ;;  %v3423_v38 = vsub.f32 %v3351_v30, %v3422_v58 }
 0x4e3   :  { %v2474_v0 = vand.u32 4294901760, %v2441_v23 }
 0x4e4   :  { %v3424_v17 = vand.u32 4294901760, %v3423_v38 }
 0x4e5   :  { %4598 = vmatpush3.msra.mxu0 %v2474_v0  ;;  %v2551_v21 = vsub.f32 %v2441_v23, %v2474_v0 }
 0x4e6   :  { %4600 = vmatmul.mubr.f32.vlgmr.msra.gmra.mxu0 %v2513_v32  ;;  %4602 = vmatprep.subr.mxu0 %v7233_v9  ;;  %v3425_v32 = vsub.f32 %v3423_v38, %v3424_v17 }
 0x4e7   :  { %v2552_v49 = vand.u32 4294901760, %v2551_v21  ;;  %4604 = vmatprep.mubr.msk.f32.mxu0 %vm7645_vm8, %v7233_v9 }
 0x4e9   :  { %v2553_v24 = vsub.f32 %v2551_v21, %v2552_v49 }
 0x4eb   :  { %v2554_v55 = vand.u32 4294901760, %v2553_v24 }
 0x4ed   :  { %4603 = vmatpush3.msra.mxu0 %v2554_v55 }
 0x4ee   :  { %4605 = vmatmul.mubr.f32.vlgmr.msra.gmra.mxu0 %v2509_v20  ;;  %4607 = vmatprep.subr.mxu0 %v7233_v9 }
 0x4ef   :  { %4608 = vmatpush3.msra.mxu0 %v2551_v21  ;;  %4609 = vmatprep.mubr.msk.f32.mxu0 %vm7645_vm8, %v7233_v9  ;;  %v3426_v21 = vand.u32 4294901760, %v3425_v32 }
 0x4f0   :  { %4612 = vmatprep.subr.mxu0 %v7233_v9 }
 0x4f2   :  { %4610 = vmatmul.mubr.f32.vlgmr.msra.gmra.mxu0 %v2510_v63 }
 0x4f3   :  { %4613 = vmatpush3.msra.mxu0 %v2474_v0  ;;  %4614 = vmatprep.mubr.msk.f32.mxu0 %vm7645_vm8, %v7233_v9 }
 0x4f4   :  { %4617 = vmatprep.subr.mxu0 %v7233_v9 }
 0x4f6   :  { %4615 = vmatmul.mubr.f32.vlgmr.msra.gmra.mxu0 %v2511_v14 }
 0x4f7   :  { %4618 = vmatpush3.msra.mxu0 %v2552_v49  ;;  %4619 = vmatprep.mubr.msk.f32.mxu0 %vm7645_vm8, %v7233_v9 }
 0x4f8   :  { %4622 = vmatprep.subr.mxu0 %v7233_v9 }
 0x4fa   :  { %4620 = vmatmul.mubr.f32.vlgmr.msra.gmra.mxu0 %v2509_v20 }
 0x4fb   :  { %4623 = vmatpush3.msra.mxu0 %v2474_v0  ;;  %4624 = vmatprep.mubr.msk.f32.mxu0 %vm7645_vm8, %v7233_v9 }
 0x4fc   :  { %4627 = vmatprep.subr.mxu0 %v7233_v9 }
 0x4fe   :  { %4625 = vmatmul.mubr.f32.vlgmr.msra.gmra.mxu0 %v2509_v20 }
 0x4ff   :  { %4628 = vmatpush3.msra.mxu0 %v2925_v57  ;;  %4629 = vmatprep.mubr.msk.f32.mxu0 %vm7645_vm8, %v7233_v9 }
 0x500   :  { %4632 = vmatprep.subr.mxu0 %v7233_v9 }
 0x502   :  { %4630 = vmatmul.mubr.f32.vlgmr.msra.gmra.mxu0 %v2964_v50 }
 0x503   :  { %4633 = vmatpush3.msra.mxu0 %v3005_v28  ;;  %4634 = vmatprep.mubr.msk.f32.mxu0 %vm7645_vm8, %v7233_v9 }
 0x504   :  { %4637 = vmatprep.subr.mxu0 %v7233_v9 }
 0x506   :  { %4635 = vmatmul.mubr.f32.vlgmr.msra.gmra.mxu0 %v2960_v59 }
 0x507   :  { %4638 = vmatpush3.msra.mxu0 %v3002_v53  ;;  %4639 = vmatprep.mubr.msk.f32.mxu0 %vm7645_vm8, %v7233_v9  ;;  %v3349_v53 = vpop.permute.xlu1 %3348 }
 0x508   :  { %4642 = vmatprep.subr.mxu0 %v7233_v9 }
 0x50a   :  { %4640 = vmatmul.mubr.f32.vlgmr.msra.gmra.mxu0 %v2961_v1 }
 0x50b   :  { %4643 = vmatpush3.msra.mxu0 %v2925_v57  ;;  %4644 = vmatprep.mubr.msk.f32.mxu0 %vm7645_vm8, %v7233_v9 }
 0x50c   :  { %4647 = vmatprep.subr.mxu0 %v7233_v9 }
 0x50e   :  { %4645 = vmatmul.mubr.f32.vlgmr.msra.gmra.mxu0 %v2962_v52 }
 0x50f   :  { %4648 = vmatpush3.msra.mxu0 %v3003_v61  ;;  %4649 = vmatprep.mubr.msk.f32.mxu0 %vm7645_vm8, %v7233_v9 }
 0x510   :  { %4652 = vmatprep.subr.mxu0 %v7233_v9 }
 0x512   :  { %4650 = vmatmul.mubr.f32.vlgmr.msra.gmra.mxu0 %v2960_v59 }
 0x513   :  { %4653 = vmatpush3.msra.mxu0 %v2925_v57  ;;  %4654 = vmatprep.mubr.msk.f32.mxu0 %vm7645_vm8, %v7233_v9 }
 0x514   :  { %4657 = vmatprep.subr.mxu0 %v7233_v9 }
 0x516   :  { %4655 = vmatmul.mubr.f32.vlgmr.msra.gmra.mxu0 %v2960_v59 }
 0x517   :  { %4659 = vmatprep.mubr.msk.f32.mxu0 %vm7645_vm8, %v7233_v9 }
 0x5a6   :  { %v2515_v13 = vpop.f32.mrf.mxu0 }
 0x5a8   :  { %v4601_v11 = vpop.f32.mrf.mxu0 }
 0x5ae   :  { %v2591_v36 = vpop.f32.mrf.mxu0 }
 0x5af   :  { %v2592_v35 = vadd.f32 %v2591_v36, %v2515_v13  ;;  %v3808_v36 = vsel %vm7654_vm3, %v6690_v42, 0 }
 0x5b0   :  { %v4606_v46 = vpop.f32.mrf.mxu0 }
 0x5b2   :  { %v2665_v51 = vpop.f32.mrf.mxu0 }
 0x5b3   :  { %v2666_v18 = vadd.f32 %v2665_v51, %v2592_v35 }
 0x5b4   :  { %v4611_v33 = vpop.f32.mrf.mxu0 }
 0x5b6   :  { %v2739_v5 = vpop.f32.mrf.mxu0 }
 0x5b7   :  { %v2740_v15 = vadd.f32 %v2739_v5, %v2666_v18  ;;  %v3879_v5 = vand.u32 4294901760, %v3808_v36 }
 0x5b8   :  { %v4616_v41 = vpop.f32.mrf.mxu0 }
 0x5ba   :  { %v2813_v16 = vpop.f32.mrf.mxu0 }
 0x5bb   :  { %v2814_v7 = vadd.f32 %v2813_v16, %v2740_v15 }
 0x5bc   :  { %v4621_v37 = vpop.f32.mrf.mxu0 }
 0x5bd   :  { %v3880_v37 = vsub.f32 %v3808_v36, %v3879_v5 }
 0x5be   :  { %v2885_v31 = vpop.f32.mrf.mxu0 }
 0x5bf   :  { %v2886_v12 = vadd.f32 %v2885_v31, %v2814_v7  ;;  %v3881_v31 = vand.u32 4294901760, %v3880_v37 }
 0x5c0   :  { %v4626_v25 = vpop.f32.mrf.mxu0 }
 0x5c1   :  { %v3882_v25 = vsub.f32 %v3880_v37, %v3881_v31 }
 0x5c2   :  { %v2966_v22 = vpop.f32.mrf.mxu0 }
 0x5c3   :  { %v2967_v8 = vadd.f32 %v2966_v22, %v2886_v12 }
 0x5c4   :  { %v4631_v10 = vpop.f32.mrf.mxu0 }
 0x5c5   :  { %v3883_v10 = vand.u32 4294901760, %v3882_v25 }
 0x5c6   :  { %v3042_v2 = vpop.f32.mrf.mxu0 }
 0x5c7   :  { %v3043_v34 = vadd.f32 %v3042_v2, %v2967_v8 }
 0x5c8   :  { %v4636_v27 = vpop.f32.mrf.mxu0 }
 0x5ca   :  { %v3116_v6 = vpop.f32.mrf.mxu0 }
 0x5cb   :  { %v3117_v3 = vadd.f32 %v3116_v6, %v3043_v34 }
 0x5cc   :  { %v4641_v47 = vpop.f32.mrf.mxu0 }
 0x5cd   :  { %v3806_v47 = vpop.permute.xlu0 %3805 }
 0x5ce   :  { %v3190_v26 = vpop.f32.mrf.mxu0 }
 0x5cf   :  { %v3191_v43 = vadd.f32 %v3190_v26, %v3117_v3 }
 0x5d0   :  { %v4646_v39 = vpop.f32.mrf.mxu0 }
 0x5d2   :  { %v3264_v20 = vpop.f32.mrf.mxu0 }
 0x5d3   :  { %v3265_v63 = vadd.f32 %v3264_v20, %v3191_v43 }
 0x5d4   :  { %v4651_v19 = vpop.f32.mrf.mxu0 }
 0x5d6   :  { %v3336_v40 = vpop.f32.mrf.mxu0 }
 0x5d7   :  { %v3337_v14 = vadd.f32 %v3336_v40, %v3265_v63 }
 0x5d8   :  { %v4656_v56 = vpop.f32.mrf.mxu0 }
 0x5d9   :  { %v3344_v54 = vadd.f32 %v3342_v44, %v3337_v14 }
 0x5db   :  { %4737 = vtanh.f32 %v3344_v54 }
 0x5e8   :  { %v4738_v23 = vpop.eup %4737 }
 0x5e9   :  { %v3354_v0 = vsel %vm7653_vm10, %v4738_v23, 0 }
 0x5ea   :  { %v3387_v49 = vand.u32 4294901760, %v3354_v0 }
 0x5ec   :  { %4658 = vmatpush3.msra.mxu0 %v3387_v49  ;;  %v3464_v24 = vsub.f32 %v3354_v0, %v3387_v49 }
 0x5ed   :  { %4660 = vmatmul.mubr.f32.vlgmr.msra.gmra.mxu0 %v3426_v21  ;;  %4662 = vmatprep.subr.mxu0 %v7233_v9 }
 0x5ee   :  { %v3465_v4 = vand.u32 4294901760, %v3464_v24  ;;  %4664 = vmatprep.mubr.msk.f32.mxu0 %vm7645_vm8, %v7233_v9 }
 0x5f0   :  { %4678 = vmatpush3.msra.mxu1 %v3465_v4  ;;  %v3466_v62 = vsub.f32 %v3464_v24, %v3465_v4 }
 0x5f1   :  { %4680 = vmatmul.mubr.f32.vlgmr.msra.gmra.mxu1 %v3422_v58  ;;  %4687 = vmatprep.subr.mxu1 %v7233_v9 }
 0x5f2   :  { %v3467_v55 = vand.u32 4294901760, %v3466_v62  ;;  %4689 = vmatprep.mubr.msk.f32.mxu1 %vm7645_vm8, %v7233_v9 }
 0x5f4   :  { %4663 = vmatpush3.msra.mxu0 %v3467_v55 }
 0x5f5   :  { %4665 = vmatmul.mubr.f32.vlgmr.msra.gmra.mxu0 %v3422_v58  ;;  %4667 = vmatprep.subr.mxu0 %v7233_v9 }
 0x5f6   :  { %4668 = vmatpush3.msra.mxu0 %v3464_v24  ;;  %4669 = vmatprep.mubr.msk.f32.mxu0 %vm7645_vm8, %v7233_v9 }
 0x5f7   :  { %4672 = vmatprep.subr.mxu0 %v7233_v9 }
 0x5f9   :  { %4670 = vmatmul.mubr.f32.vlgmr.msra.gmra.mxu0 %v3423_v38 }
 0x5fa   :  { %4673 = vmatpush3.msra.mxu0 %v3387_v49  ;;  %4674 = vmatprep.mubr.msk.f32.mxu0 %vm7645_vm8, %v7233_v9 }
 0x5fb   :  { %4682 = vmatprep.subr.mxu0 %v7233_v9 }
 0x5fd   :  { %4675 = vmatmul.mubr.f32.vlgmr.msra.gmra.mxu0 %v3424_v17 }
 0x5fe   :  { %4683 = vmatpush3.msra.mxu0 %v3387_v49  ;;  %4684 = vmatprep.mubr.msk.f32.mxu0 %vm7645_vm8, %v7233_v9 }
 0x5ff   :  { %4692 = vmatprep.subr.mxu0 %v7233_v9 }
 0x601   :  { %4685 = vmatmul.mubr.f32.vlgmr.msra.gmra.mxu0 %v3422_v58 }
 0x602   :  { %4694 = vmatprep.mubr.msk.f32.mxu0 %vm7645_vm8, %v7233_v9 }
 0x6ad   :  { %v3428_v59 = vpop.f32.mrf.mxu0 }
 0x6ae   :  { %v3429_v61 = vadd.f32 %v3428_v59, %v3349_v53 }
 0x6af   :  { %v4661_v45 = vpop.f32.mrf.mxu0 }
 0x6b1   :  { %v3726_v48 = vpop.f32.mrf.mxu1 }
 0x6b3   :  { %v4681_v57 = vpop.f32.mrf.mxu1 }
 0x6b5   :  { %v3504_v1 = vpop.f32.mrf.mxu0 }
 0x6b6   :  { %v3505_v29 = vadd.f32 %v3504_v1, %v3429_v61 }
 0x6b7   :  { %v4666_v52 = vpop.f32.mrf.mxu0 }
 0x6b9   :  { %v3578_v60 = vpop.f32.mrf.mxu0 }
 0x6ba   :  { %v3579_v28 = vadd.f32 %v3578_v60, %v3505_v29 }
 0x6bb   :  { %v4671_v50 = vpop.f32.mrf.mxu0 }
 0x6bd   :  { %v3652_v13 = vpop.f32.mrf.mxu0 }
 0x6be   :  { %v3653_v11 = vadd.f32 %v3652_v13, %v3579_v28 }
 0x6bf   :  { %v4676_v46 = vpop.f32.mrf.mxu0 }
 0x6c0   :  { %v3727_v51 = vadd.f32 %v3726_v48, %v3653_v11 }
 0x6c1   :  { %v3798_v33 = vpop.f32.mrf.mxu0 }
 0x6c2   :  { %v3799_v41 = vadd.f32 %v3798_v33, %v3727_v51 }
 0x6c3   :  { %v4686_v16 = vpop.f32.mrf.mxu0 }
 0x6c4   :  { %4739 = vtanh.f32 %v3799_v41 }
 0x6d1   :  { %v4740_v22 = vpop.eup %4739 }
 0x6d2   :  { %v3811_v35 = vsel %vm7655_vm15, %v4740_v22, 0 }
 0x6d3   :  { %v3844_v18 = vand.u32 4294901760, %v3811_v35 }
 0x6d5   :  { %4688 = vmatpush3.msra.mxu1 %v3844_v18  ;;  %v3921_v2 = vsub.f32 %v3811_v35, %v3844_v18 }
 0x6d6   :  { %4690 = vmatmul.mubr.f32.vlgmr.msra.gmra.mxu1 %v3883_v10  ;;  %4697 = vmatprep.subr.mxu1 %v7233_v9 }
 0x6d7   :  { %4698 = vmatpush3.msra.mxu1 %v3921_v2  ;;  %4699 = vmatprep.mubr.msk.f32.mxu1 %vm7645_vm8, %v7233_v9  ;;  %v3922_v42 = vand.u32 4294901760, %v3921_v2 }
 0x6d8   :  { %4707 = vmatprep.subr.mxu1 %v7233_v9 }
 0x6d9   :  { %v3923_v15 = vsub.f32 %v3921_v2, %v3922_v42 }
 0x6da   :  { %4700 = vmatmul.mubr.f32.vlgmr.msra.gmra.mxu1 %v3880_v37 }
 0x6db   :  { %4708 = vmatpush3.msra.mxu1 %v3922_v42  ;;  %v3924_v27 = vand.u32 4294901760, %v3923_v15  ;;  %4709 = vmatprep.mubr.msk.f32.mxu1 %vm7645_vm8, %v7233_v9 }
 0x6dd   :  { %4693 = vmatpush3.msra.mxu0 %v3924_v27 }
 0x6de   :  { %4695 = vmatmul.mubr.f32.vlgmr.msra.gmra.mxu0 %v3879_v5  ;;  %4702 = vmatprep.subr.mxu0 %v7233_v9 }
 0x6df   :  { %4703 = vmatpush3.msra.mxu0 %v3844_v18  ;;  %4704 = vmatprep.mubr.msk.f32.mxu0 %vm7645_vm8, %v7233_v9 }
 0x6e0   :  { %4712 = vmatprep.subr.mxu0 %v7233_v9  ;;  %4710 = vmatmul.mubr.f32.vlgmr.msra.gmra.mxu1 %v3879_v5 }
 0x6e2   :  { %4705 = vmatmul.mubr.f32.vlgmr.msra.gmra.mxu0 %v3881_v31 }
 0x6e3   :  { %4713 = vmatpush3.msra.mxu0 %v3844_v18  ;;  %4714 = vmatprep.mubr.msk.f32.mxu0 %vm7645_vm8, %v7233_v9 }
 0x6e6   :  { %4715 = vmatmul.mubr.f32.vlgmr.msra.gmra.mxu0 %v3879_v5 }
 0x796   :  { %v3885_v7 = vpop.f32.mrf.mxu1 }
 0x797   :  { %v3886_v26 = vadd.f32 %v3885_v7, %v3806_v47 }
 0x798   :  { %v4691_v6 = vpop.f32.mrf.mxu1 }
 0x79a   :  { %v4035_v12 = vpop.f32.mrf.mxu1 }
 0x79c   :  { %v4701_v8 = vpop.f32.mrf.mxu1 }
 0x79e   :  { %v3961_v34 = vpop.f32.mrf.mxu0 }
 0x79f   :  { %v3962_v39 = vadd.f32 %v3961_v34, %v3886_v26 }
 0x7a0   :  { %v4696_v3 = vpop.f32.mrf.mxu0  ;;  %v4183_v20 = vpop.f32.mrf.mxu1 }
 0x7a1   :  { %v4036_v43 = vadd.f32 %v4035_v12, %v3962_v39 }
 0x7a2   :  { %v4109_v19 = vpop.f32.mrf.mxu0  ;;  %v4711_v63 = vpop.f32.mrf.mxu1 }
 0x7a3   :  { %v4110_v30 = vadd.f32 %v4109_v19, %v4036_v43 }
 0x7a4   :  { %v4706_v40 = vpop.f32.mrf.mxu0 }
 0x7a5   :  { %v4184_v14 = vadd.f32 %v4183_v20, %v4110_v30 }
 0x7a6   :  { %v4255_v44 = vpop.f32.mrf.mxu0 }
 0x7a7   :  { %v4256_v56 = vadd.f32 %v4255_v44, %v4184_v14 }
 0x7a8   :  { %v4716_v9 = vpop.f32.mrf.mxu0 }
 0x7a9   :  { %4259 = vst [vmem:[%s6914_s4] sm:$0xf] %v4256_v56 }

</bundles_post_ra>
